<compile_context>
chip_gen: v5e
topology: v5e:2x2
jax: 0.10.0
libtpu: 0.0.40
codegen_flags: <defaults>
</compile_context>

<pallas_src>
import functools

import jax
import jax.numpy as jnp
from jax.experimental import pallas as pl
from jax.experimental.pallas import tpu as pltpu


def _rms_norm(x, w, eps):
    var = jnp.mean(x * x, axis=-1, keepdims=True)
    return (x * jax.lax.rsqrt(var + eps)) * w


def qwen2_block_kernel(num_heads, num_kv_heads, head_dim, rms_eps, use_final_ln,
                       x_ref, mask_ref, cos_ref, sin_ref,
                       wqkv_ref, bqkv_ref, wo_ref, wgu_ref, wd_ref,
                       ln_in_ref, ln_post_ref, ln_final_ref,
                       out_ref, ctx_ref):
    x = x_ref[...]                                   # (S, H) f32
    seq = x.shape[0]
    D = head_dim
    q_dim = num_heads * D
    kv_dim = num_kv_heads * D
    group = num_heads // num_kv_heads

    # ---- input RMSNorm (f32 vector math) ----
    h = _rms_norm(x, ln_in_ref[...], rms_eps)

    # ---- fused QKV projection: bf16 MXU inputs, f32 accumulation, f32 bias add ----
    qkv = jnp.dot(h.astype(jnp.bfloat16), wqkv_ref[...],
                  preferred_element_type=jnp.float32) + bqkv_ref[...]
    scale = 1.0 / (D ** 0.5)
    q = qkv[:, :q_dim] * scale                       # fold 1/sqrt(D) into q once
    k = qkv[:, q_dim:q_dim + kv_dim]
    v = qkv[:, q_dim + kv_dim:]

    cos = cos_ref[...]                               # (S, D) f32
    sin_s = sin_ref[...]                             # sign-folded sin: [-sin | +sin]
    mask = mask_ref[...]                             # (S, S) additive f32 mask
    half = D // 2

    def rope(t):
        # t*cos + rotate_half(t)*sin  ==  t*cos + [t2, t1]*sin_signed
        swapped = jnp.concatenate([t[:, half:], t[:, :half]], axis=-1)
        return t * cos + swapped * sin_s

    # ---- per-head attention; contexts land in a bf16 VMEM scratch at lane offset h*D ----
    for hh in range(num_heads):
        g = hh // group                              # GQA: kv head for this query head
        q_h = rope(q[:, hh * D:(hh + 1) * D])
        k_h = rope(k[:, g * D:(g + 1) * D])
        v_h = v[:, g * D:(g + 1) * D]

        scores = jax.lax.dot_general(
            q_h.astype(jnp.bfloat16), k_h.astype(jnp.bfloat16),
            (((1,), (1,)), ((), ())),
            preferred_element_type=jnp.float32) + mask
        m = jnp.max(scores, axis=-1, keepdims=True)
        e = jnp.exp(scores - m)
        p = e * pl.reciprocal(jnp.sum(e, axis=-1, keepdims=True), approx=True)
        ctx_h = jnp.dot(p.astype(jnp.bfloat16), v_h.astype(jnp.bfloat16),
                        preferred_element_type=jnp.float32)
        ctx_ref[:, hh * D:(hh + 1) * D] = ctx_h.astype(jnp.bfloat16)

    attn_out = jnp.dot(ctx_ref[...], wo_ref[...],
                       preferred_element_type=jnp.float32)
    resid1 = x + attn_out

    # ---- post-attention RMSNorm + fused SwiGLU MLP ----
    h2 = _rms_norm(resid1, ln_post_ref[...], rms_eps)
    gu = jnp.dot(h2.astype(jnp.bfloat16), wgu_ref[...],
                 preferred_element_type=jnp.float32)
    inter = gu.shape[1] // 2
    gate = gu[:, :inter]
    up = gu[:, inter:]
    act = gate * jax.nn.sigmoid(gate) * up           # SiLU(gate) * up, f32
    mlp = jnp.dot(act.astype(jnp.bfloat16), wd_ref[...],
                  preferred_element_type=jnp.float32)
    resid2 = resid1 + mlp

    if use_final_ln:
        # final RMSNorm then take the last token (RMSNorm is per-row, order commutes)
        last = resid2[seq - 1:seq, :]
        out_ref[...] = _rms_norm(last, ln_final_ref[...], rms_eps)
    else:
        out_ref[...] = resid2


def qwen2_block(hidden_states, attention_mask, position_ids, params, *,
                num_heads, num_kv_heads, head_dim, rope_theta=1e6,
                rms_eps=1e-6, use_final_ln=False):
    hidden = params["wq"].shape[0]
    x = hidden_states.reshape(-1, hidden).astype(jnp.float32)   # view(1, -1, hidden)
    seq = x.shape[0]
    D = head_dim
    q_dim = num_heads * D
    kv_dim = num_kv_heads * D

    # rotary cos/sin from position_ids (theta = rope_theta ** -(2i/D), matching the torch code)
    theta = 1.0 / (rope_theta ** (jnp.arange(0, D, 2, dtype=jnp.float32) / D))
    pos = position_ids.reshape(-1).astype(jnp.float32)
    idx_theta = pos[:, None] * theta[None, :]
    emb = jnp.concatenate([idx_theta, idx_theta], axis=-1)       # (S, D)
    cos = jnp.cos(emb)
    sin = jnp.sin(emb)
    lane = jnp.arange(D)[None, :]
    sin_signed = jnp.where(lane < D // 2, -sin, sin)             # hoisted rotate_half sign

    mask2d = attention_mask.reshape(seq, seq).astype(jnp.float32)

    # fused + bf16-cast weights (MXU-friendly); biases and norm weights stay f32.
    wqkv = jnp.concatenate([params["wq"], params["wk"], params["wv"]],
                           axis=1).astype(jnp.bfloat16)
    bqkv = jnp.concatenate([params["bq"], params["bk"], params["bv"]],
                           axis=-1).reshape(1, q_dim + 2 * kv_dim).astype(jnp.float32)
    wo = params["wo"].astype(jnp.bfloat16)
    wgu = jnp.concatenate([params["wg"], params["wu"]], axis=1).astype(jnp.bfloat16)
    wd = params["wd"].astype(jnp.bfloat16)
    ln_in = params["ln_in"].reshape(1, hidden).astype(jnp.float32)
    ln_post = params["ln_post"].reshape(1, hidden).astype(jnp.float32)
    ln_final = params["ln_final"].reshape(1, hidden).astype(jnp.float32)

    out_rows = 1 if use_final_ln else seq
    kernel = functools.partial(qwen2_block_kernel, num_heads, num_kv_heads,
                               head_dim, rms_eps, use_final_ln)

    inputs = (x, mask2d, cos, sin_signed, wqkv, bqkv, wo, wgu, wd,
              ln_in, ln_post, ln_final)

    def full_spec(a):
        nd = a.ndim
        return pl.BlockSpec(a.shape, lambda i, _n=nd: (0,) * _n)

    out = pl.pallas_call(
        kernel,
        grid=(1,),
        in_specs=[full_spec(a) for a in inputs],
        out_specs=pl.BlockSpec((out_rows, hidden), lambda i: (0, 0)),
        out_shape=jax.ShapeDtypeStruct((out_rows, hidden), jnp.float32),
        scratch_shapes=[pltpu.VMEM((seq, q_dim), jnp.bfloat16)],
        compiler_params=pltpu.CompilerParams(
            dimension_semantics=("arbitrary",),
            vmem_limit_bytes=64 * 1024 * 1024),
    )(*inputs)

    return out.reshape(1, out_rows, hidden)


def qwen2_block_ref(hidden_states, attention_mask, position_ids, params, *,
                    num_heads, num_kv_heads, head_dim, rope_theta, rms_eps,
                    use_final_ln):
    """Pure-JAX f32 reference for correctness checking."""
    hidden = params["wq"].shape[0]
    x = hidden_states.reshape(-1, hidden).astype(jnp.float32)
    seq = x.shape[0]
    D = head_dim

    def rms(t, w):
        return t * jax.lax.rsqrt(jnp.mean(t * t, -1, keepdims=True) + rms_eps) * w.reshape(1, -1)

    theta = 1.0 / (rope_theta ** (jnp.arange(0, D, 2, dtype=jnp.float32) / D))
    pos = position_ids.reshape(-1).astype(jnp.float32)
    emb = jnp.concatenate([pos[:, None] * theta, pos[:, None] * theta], -1)
    cos, sin = jnp.cos(emb), jnp.sin(emb)

    def rot_half(t):
        return jnp.concatenate([-t[:, D // 2:], t[:, :D // 2]], -1)

    h = rms(x, params["ln_in"])
    q = h @ params["wq"] + params["bq"]
    k = h @ params["wk"] + params["bk"]
    v = h @ params["wv"] + params["bv"]
    mask = attention_mask.reshape(seq, seq)
    group = num_heads // num_kv_heads
    ctx = []
    for hh in range(num_heads):
        g = hh // group
        q_h = q[:, hh * D:(hh + 1) * D]
        k_h = k[:, g * D:(g + 1) * D]
        v_h = v[:, g * D:(g + 1) * D]
        q_h = q_h * cos + rot_half(q_h) * sin
        k_h = k_h * cos + rot_half(k_h) * sin
        s = (q_h @ k_h.T) / (D ** 0.5) + mask
        p = jax.nn.softmax(s, axis=-1)
        ctx.append(p @ v_h)
    attn = jnp.concatenate(ctx, -1) @ params["wo"]
    r1 = x + attn
    h2 = rms(r1, params["ln_post"])
    gate = h2 @ params["wg"]
    up = h2 @ params["wu"]
    mlp = (gate * jax.nn.sigmoid(gate) * up) @ params["wd"]
    r2 = r1 + mlp
    if use_final_ln:
        return rms(r2[-1:], params["ln_final"]).reshape(1, 1, hidden)
    return r2.reshape(1, seq, hidden)


if __name__ == "__main__":
    hidden_size = 256
    num_heads = 2
    num_kv_heads = 1                      # Qwen2-style GQA
    head_dim = hidden_size // num_heads   # 128
    seq = 8
    inter = 512
    rope_theta = 1e6                      # Qwen2 default
    rms_eps = 1e-6

    key = jax.random.PRNGKey(0)
    ks = jax.random.split(key, 12)
    s = 0.02
    q_dim = num_heads * head_dim
    kv_dim = num_kv_heads * head_dim
    params = dict(
        wq=jax.random.normal(ks[0], (hidden_size, q_dim), jnp.float32) * s,
        wk=jax.random.normal(ks[1], (hidden_size, kv_dim), jnp.float32) * s,
        wv=jax.random.normal(ks[2], (hidden_size, kv_dim), jnp.float32) * s,
        bq=jax.random.normal(ks[3], (q_dim,), jnp.float32) * s,
        bk=jax.random.normal(ks[4], (kv_dim,), jnp.float32) * s,
        bv=jax.random.normal(ks[5], (kv_dim,), jnp.float32) * s,
        wo=jax.random.normal(ks[6], (q_dim, hidden_size), jnp.float32) * s,
        wg=jax.random.normal(ks[7], (hidden_size, inter), jnp.float32) * s,
        wu=jax.random.normal(ks[8], (hidden_size, inter), jnp.float32) * s,
        wd=jax.random.normal(ks[9], (inter, hidden_size), jnp.float32) * s,
        ln_in=jnp.ones((hidden_size,), jnp.float32),
        ln_post=jnp.ones((hidden_size,), jnp.float32),
        ln_final=jnp.ones((hidden_size,), jnp.float32),
    )

    hidden_states = jax.random.normal(ks[10], (1, seq, hidden_size), jnp.float32)
    position_ids = jnp.arange(seq, dtype=jnp.int32)[None, :]
    neg = jnp.finfo(jnp.float32).min
    q_idx = jnp.arange(seq)[:, None]
    k_idx = jnp.arange(seq)[None, :]
    attention_mask = jnp.where(k_idx <= q_idx, 0.0, neg).astype(
        jnp.float32)[None, None]                                  # (1,1,S,S)

    run = functools.partial(
        qwen2_block, num_heads=num_heads, num_kv_heads=num_kv_heads,
        head_dim=head_dim, rope_theta=rope_theta, rms_eps=rms_eps)
    ref = functools.partial(
        qwen2_block_ref, num_heads=num_heads, num_kv_heads=num_kv_heads,
        head_dim=head_dim, rope_theta=rope_theta, rms_eps=rms_eps)

    # case: final_layernorm provided (last block) -> (1, 1, hidden)
    out_last = run(hidden_states, attention_mask, position_ids, params,
                   use_final_ln=True)
    # case: final_layernorm is None -> (1, seq, hidden)
    out_full = run(hidden_states, attention_mask, position_ids, params,
                   use_final_ln=False)
    jax.block_until_ready((out_last, out_full))

    ref_last = ref(hidden_states, attention_mask, position_ids, params,
                   use_final_ln=True)
    ref_full = ref(hidden_states, attention_mask, position_ids, params,
                   use_final_ln=False)

    assert out_last.shape == (1, 1, hidden_size)
    assert out_full.shape == (1, seq, hidden_size)
    assert bool(jnp.all(jnp.isfinite(out_full)))
    assert jnp.allclose(out_last, ref_last, atol=3e-2, rtol=3e-2)
    assert jnp.allclose(out_full, ref_full, atol=3e-2, rtol=3e-2)
    print("KERNEL_OK")
</pallas_src>

<mosaic_0001>
module attributes {stable_mosaic.version = 11 : i64} {
  func.func @qwen2_block_kernel(%arg0: i32, %arg1: memref<8x256xf32, #tpu.memory_space<vmem>>, %arg2: memref<8x8xf32, #tpu.memory_space<vmem>>, %arg3: memref<8x128xf32, #tpu.memory_space<vmem>>, %arg4: memref<8x128xf32, #tpu.memory_space<vmem>>, %arg5: memref<256x512xbf16, #tpu.memory_space<vmem>>, %arg6: memref<1x512xf32, #tpu.memory_space<vmem>>, %arg7: memref<256x256xbf16, #tpu.memory_space<vmem>>, %arg8: memref<256x1024xbf16, #tpu.memory_space<vmem>>, %arg9: memref<512x256xbf16, #tpu.memory_space<vmem>>, %arg10: memref<1x256xf32, #tpu.memory_space<vmem>>, %arg11: memref<1x256xf32, #tpu.memory_space<vmem>>, %arg12: memref<1x256xf32, #tpu.memory_space<vmem>>, %arg13: memref<1x256xf32, #tpu.memory_space<vmem>>, %arg14: memref<8x256xbf16, #tpu.memory_space<vmem>>) attributes {dimension_semantics = [#tpu.dimension_semantics<arbitrary>], iteration_bounds = array<i64: 1>, scalar_prefetch = 0 : i64, scratch_operands = 1 : i64, tpu.core_type = #tpu.core_type<tc>, window_params = [{pipeline_mode = #tpu.pipeline_mode<synchronous>, transform_indices = @transform_0, window_bounds = array<i64: 8, 256>}, {pipeline_mode = #tpu.pipeline_mode<synchronous>, transform_indices = @transform_1, window_bounds = array<i64: 8, 8>}, {pipeline_mode = #tpu.pipeline_mode<synchronous>, transform_indices = @transform_2, window_bounds = array<i64: 8, 128>}, {pipeline_mode = #tpu.pipeline_mode<synchronous>, transform_indices = @transform_3, window_bounds = array<i64: 8, 128>}, {pipeline_mode = #tpu.pipeline_mode<synchronous>, transform_indices = @transform_4, window_bounds = array<i64: 256, 512>}, {pipeline_mode = #tpu.pipeline_mode<synchronous>, transform_indices = @transform_5, window_bounds = array<i64: 1, 512>}, {pipeline_mode = #tpu.pipeline_mode<synchronous>, transform_indices = @transform_6, window_bounds = array<i64: 256, 256>}, {pipeline_mode = #tpu.pipeline_mode<synchronous>, transform_indices = @transform_7, window_bounds = array<i64: 256, 1024>}, {pipeline_mode = #tpu.pipeline_mode<synchronous>, transform_indices = @transform_8, window_bounds = array<i64: 512, 256>}, {pipeline_mode = #tpu.pipeline_mode<synchronous>, transform_indices = @transform_9, window_bounds = array<i64: 1, 256>}, {pipeline_mode = #tpu.pipeline_mode<synchronous>, transform_indices = @transform_10, window_bounds = array<i64: 1, 256>}, {pipeline_mode = #tpu.pipeline_mode<synchronous>, transform_indices = @transform_11, window_bounds = array<i64: 1, 256>}, {pipeline_mode = #tpu.pipeline_mode<synchronous>, transform_indices = @transform_12, window_bounds = array<i64: 1, 256>}]} {
    %c0 = arith.constant 0 : index
    %c0_0 = arith.constant 0 : index
    %0 = vector.load %arg1[%c0, %c0_0] : memref<8x256xf32, #tpu.memory_space<vmem>>, vector<8x256xf32>
    %c0_1 = arith.constant 0 : index
    %c0_2 = arith.constant 0 : index
    %1 = vector.load %arg10[%c0_1, %c0_2] : memref<1x256xf32, #tpu.memory_space<vmem>>, vector<1x256xf32>
    %2 = arith.mulf %0, %0 : vector<8x256xf32>
    %cst = arith.constant dense<0.000000e+00> : vector<8xf32>
    %3 = vector.multi_reduction <add>, %2, %cst [1] : vector<8x256xf32> to vector<8xf32>
    %4 = vector.shape_cast %3 : vector<8xf32> to vector<8x1xf32>
    %cst_3 = arith.constant 2.560000e+02 : f32
    %5 = vector.broadcast %cst_3 : f32 to vector<8x1xf32>
    %6 = arith.divf %4, %5 : vector<8x1xf32>
    %cst_4 = arith.constant 9.99999997E-7 : f32
    %7 = vector.broadcast %cst_4 : f32 to vector<8x1xf32>
    %8 = arith.addf %6, %7 : vector<8x1xf32>
    %9 = math.rsqrt %8 : vector<8x1xf32>
    %10 = vector.broadcast %9 : vector<8x1xf32> to vector<8x256xf32>
    %11 = arith.mulf %0, %10 : vector<8x256xf32>
    %12 = vector.broadcast %1 : vector<1x256xf32> to vector<8x256xf32>
    %13 = arith.mulf %11, %12 : vector<8x256xf32>
    %14 = arith.truncf %13 : vector<8x256xf32> to vector<8x256xbf16>
    %c0_5 = arith.constant 0 : index
    %c0_6 = arith.constant 0 : index
    %15 = vector.load %arg5[%c0_5, %c0_6] : memref<256x512xbf16, #tpu.memory_space<vmem>>, vector<256x512xbf16>
    %cst_7 = arith.constant dense<0.000000e+00> : vector<8x512xf32>
    %16 = tpu.matmul %14, %15, %cst_7 {dimension_numbers = #tpu.dot_dimension_numbers<[1], [0], [0], [1], [0, 0, 1, 1], [], []>} : vector<8x256xbf16>, vector<256x512xbf16>, vector<8x512xf32> -> vector<8x512xf32>
    %c0_8 = arith.constant 0 : index
    %c0_9 = arith.constant 0 : index
    %17 = vector.load %arg6[%c0_8, %c0_9] : memref<1x512xf32, #tpu.memory_space<vmem>>, vector<1x512xf32>
    %18 = vector.broadcast %17 : vector<1x512xf32> to vector<8x512xf32>
    %19 = arith.addf %16, %18 : vector<8x512xf32>
    %20 = vector.extract_strided_slice %19 {offsets = [0, 0], sizes = [8, 256], strides = [1, 1]} : vector<8x512xf32> to vector<8x256xf32>
    %cst_10 = arith.constant 0.0883883461 : f32
    %21 = vector.broadcast %cst_10 : f32 to vector<8x256xf32>
    %22 = arith.mulf %20, %21 : vector<8x256xf32>
    %23 = vector.extract_strided_slice %19 {offsets = [0, 256], sizes = [8, 128], strides = [1, 1]} : vector<8x512xf32> to vector<8x128xf32>
    %24 = vector.extract_strided_slice %19 {offsets = [0, 384], sizes = [8, 128], strides = [1, 1]} : vector<8x512xf32> to vector<8x128xf32>
    %c0_11 = arith.constant 0 : index
    %c0_12 = arith.constant 0 : index
    %25 = vector.load %arg3[%c0_11, %c0_12] : memref<8x128xf32, #tpu.memory_space<vmem>>, vector<8x128xf32>
    %c0_13 = arith.constant 0 : index
    %c0_14 = arith.constant 0 : index
    %26 = vector.load %arg4[%c0_13, %c0_14] : memref<8x128xf32, #tpu.memory_space<vmem>>, vector<8x128xf32>
    %c0_15 = arith.constant 0 : index
    %c0_16 = arith.constant 0 : index
    %27 = vector.load %arg2[%c0_15, %c0_16] : memref<8x8xf32, #tpu.memory_space<vmem>>, vector<8x8xf32>
    %28 = vector.extract_strided_slice %22 {offsets = [0, 0], sizes = [8, 128], strides = [1, 1]} : vector<8x256xf32> to vector<8x128xf32>
    %29 = vector.extract_strided_slice %28 {offsets = [0, 64], sizes = [8, 64], strides = [1, 1]} : vector<8x128xf32> to vector<8x64xf32>
    %30 = vector.extract_strided_slice %28 {offsets = [0, 0], sizes = [8, 64], strides = [1, 1]} : vector<8x128xf32> to vector<8x64xf32>
    %31 = tpu.concatenate %29, %30 in 1 : vector<8x64xf32>, vector<8x64xf32> -> vector<8x128xf32>
    %32 = arith.mulf %28, %25 : vector<8x128xf32>
    %33 = arith.mulf %31, %26 : vector<8x128xf32>
    %34 = arith.addf %32, %33 : vector<8x128xf32>
    %35 = vector.extract_strided_slice %23 {offsets = [0, 64], sizes = [8, 64], strides = [1, 1]} : vector<8x128xf32> to vector<8x64xf32>
    %36 = vector.extract_strided_slice %23 {offsets = [0, 0], sizes = [8, 64], strides = [1, 1]} : vector<8x128xf32> to vector<8x64xf32>
    %37 = tpu.concatenate %35, %36 in 1 : vector<8x64xf32>, vector<8x64xf32> -> vector<8x128xf32>
    %38 = arith.mulf %23, %25 : vector<8x128xf32>
    %39 = arith.mulf %37, %26 : vector<8x128xf32>
    %40 = arith.addf %38, %39 : vector<8x128xf32>
    %41 = arith.truncf %34 : vector<8x128xf32> to vector<8x128xbf16>
    %42 = arith.truncf %40 : vector<8x128xf32> to vector<8x128xbf16>
    %cst_17 = arith.constant dense<0.000000e+00> : vector<8x8xf32>
    %43 = tpu.matmul %41, %42, %cst_17 {dimension_numbers = #tpu.dot_dimension_numbers<[1], [1], [0], [0], [0, 0, 1, 0], [], []>} : vector<8x128xbf16>, vector<8x128xbf16>, vector<8x8xf32> -> vector<8x8xf32>
    %44 = arith.addf %43, %27 : vector<8x8xf32>
    %cst_18 = arith.constant dense<0xFF800000> : vector<8xf32>
    %45 = vector.multi_reduction <maximumf>, %44, %cst_18 [1] : vector<8x8xf32> to vector<8xf32>
    %46 = vector.shape_cast %45 : vector<8xf32> to vector<8x1xf32>
    %47 = vector.broadcast %46 : vector<8x1xf32> to vector<8x8xf32>
    %48 = arith.subf %44, %47 : vector<8x8xf32>
    %49 = math.exp %48 : vector<8x8xf32>
    %cst_19 = arith.constant dense<0.000000e+00> : vector<8xf32>
    %50 = vector.multi_reduction <add>, %49, %cst_19 [1] : vector<8x8xf32> to vector<8xf32>
    %51 = vector.shape_cast %50 : vector<8xf32> to vector<8x1xf32>
    %52 = tpu.reciprocal %51 {approx = true} : vector<8x1xf32> -> vector<8x1xf32>
    %53 = vector.broadcast %52 : vector<8x1xf32> to vector<8x8xf32>
    %54 = arith.mulf %49, %53 : vector<8x8xf32>
    %55 = arith.truncf %54 : vector<8x8xf32> to vector<8x8xbf16>
    %56 = arith.truncf %24 : vector<8x128xf32> to vector<8x128xbf16>
    %cst_20 = arith.constant dense<0.000000e+00> : vector<8x128xf32>
    %57 = tpu.matmul %55, %56, %cst_20 {dimension_numbers = #tpu.dot_dimension_numbers<[1], [0], [0], [1], [0, 0, 1, 1], [], []>} : vector<8x8xbf16>, vector<8x128xbf16>, vector<8x128xf32> -> vector<8x128xf32>
    %58 = arith.truncf %57 : vector<8x128xf32> to vector<8x128xbf16>
    %c0_21 = arith.constant 0 : index
    %c0_22 = arith.constant 0 : index
    %59 = vector.load %arg14[%c0_21, %c0_22] : memref<8x256xbf16, #tpu.memory_space<vmem>>, vector<8x128xbf16>
    tpu.vector_store %arg14[%c0_21, %c0_22], %58 {strides = array<i32>} : memref<8x256xbf16, #tpu.memory_space<vmem>>, vector<8x128xbf16>,
    %60 = vector.extract_strided_slice %22 {offsets = [0, 128], sizes = [8, 128], strides = [1, 1]} : vector<8x256xf32> to vector<8x128xf32>
    %61 = vector.extract_strided_slice %60 {offsets = [0, 64], sizes = [8, 64], strides = [1, 1]} : vector<8x128xf32> to vector<8x64xf32>
    %62 = vector.extract_strided_slice %60 {offsets = [0, 0], sizes = [8, 64], strides = [1, 1]} : vector<8x128xf32> to vector<8x64xf32>
    %63 = tpu.concatenate %61, %62 in 1 : vector<8x64xf32>, vector<8x64xf32> -> vector<8x128xf32>
    %64 = arith.mulf %60, %25 : vector<8x128xf32>
    %65 = arith.mulf %63, %26 : vector<8x128xf32>
    %66 = arith.addf %64, %65 : vector<8x128xf32>
    %67 = vector.extract_strided_slice %23 {offsets = [0, 64], sizes = [8, 64], strides = [1, 1]} : vector<8x128xf32> to vector<8x64xf32>
    %68 = vector.extract_strided_slice %23 {offsets = [0, 0], sizes = [8, 64], strides = [1, 1]} : vector<8x128xf32> to vector<8x64xf32>
    %69 = tpu.concatenate %67, %68 in 1 : vector<8x64xf32>, vector<8x64xf32> -> vector<8x128xf32>
    %70 = arith.mulf %23, %25 : vector<8x128xf32>
    %71 = arith.mulf %69, %26 : vector<8x128xf32>
    %72 = arith.addf %70, %71 : vector<8x128xf32>
    %73 = arith.truncf %66 : vector<8x128xf32> to vector<8x128xbf16>
    %74 = arith.truncf %72 : vector<8x128xf32> to vector<8x128xbf16>
    %cst_23 = arith.constant dense<0.000000e+00> : vector<8x8xf32>
    %75 = tpu.matmul %73, %74, %cst_23 {dimension_numbers = #tpu.dot_dimension_numbers<[1], [1], [0], [0], [0, 0, 1, 0], [], []>} : vector<8x128xbf16>, vector<8x128xbf16>, vector<8x8xf32> -> vector<8x8xf32>
    %76 = arith.addf %75, %27 : vector<8x8xf32>
    %cst_24 = arith.constant dense<0xFF800000> : vector<8xf32>
    %77 = vector.multi_reduction <maximumf>, %76, %cst_24 [1] : vector<8x8xf32> to vector<8xf32>
    %78 = vector.shape_cast %77 : vector<8xf32> to vector<8x1xf32>
    %79 = vector.broadcast %78 : vector<8x1xf32> to vector<8x8xf32>
    %80 = arith.subf %76, %79 : vector<8x8xf32>
    %81 = math.exp %80 : vector<8x8xf32>
    %cst_25 = arith.constant dense<0.000000e+00> : vector<8xf32>
    %82 = vector.multi_reduction <add>, %81, %cst_25 [1] : vector<8x8xf32> to vector<8xf32>
    %83 = vector.shape_cast %82 : vector<8xf32> to vector<8x1xf32>
    %84 = tpu.reciprocal %83 {approx = true} : vector<8x1xf32> -> vector<8x1xf32>
    %85 = vector.broadcast %84 : vector<8x1xf32> to vector<8x8xf32>
    %86 = arith.mulf %81, %85 : vector<8x8xf32>
    %87 = arith.truncf %86 : vector<8x8xf32> to vector<8x8xbf16>
    %88 = arith.truncf %24 : vector<8x128xf32> to vector<8x128xbf16>
    %cst_26 = arith.constant dense<0.000000e+00> : vector<8x128xf32>
    %89 = tpu.matmul %87, %88, %cst_26 {dimension_numbers = #tpu.dot_dimension_numbers<[1], [0], [0], [1], [0, 0, 1, 1], [], []>} : vector<8x8xbf16>, vector<8x128xbf16>, vector<8x128xf32> -> vector<8x128xf32>
    %90 = arith.truncf %89 : vector<8x128xf32> to vector<8x128xbf16>
    %c0_27 = arith.constant 0 : index
    %c128 = arith.constant 128 : index
    %91 = vector.load %arg14[%c0_27, %c128] : memref<8x256xbf16, #tpu.memory_space<vmem>>, vector<8x128xbf16>
    tpu.vector_store %arg14[%c0_27, %c128], %90 {strides = array<i32>} : memref<8x256xbf16, #tpu.memory_space<vmem>>, vector<8x128xbf16>,
    %c0_28 = arith.constant 0 : index
    %c0_29 = arith.constant 0 : index
    %92 = vector.load %arg14[%c0_28, %c0_29] : memref<8x256xbf16, #tpu.memory_space<vmem>>, vector<8x256xbf16>
    %c0_30 = arith.constant 0 : index
    %c0_31 = arith.constant 0 : index
    %93 = vector.load %arg7[%c0_30, %c0_31] : memref<256x256xbf16, #tpu.memory_space<vmem>>, vector<256x256xbf16>
    %cst_32 = arith.constant dense<0.000000e+00> : vector<8x256xf32>
    %94 = tpu.matmul %92, %93, %cst_32 {dimension_numbers = #tpu.dot_dimension_numbers<[1], [0], [0], [1], [0, 0, 1, 1], [], []>} : vector<8x256xbf16>, vector<256x256xbf16>, vector<8x256xf32> -> vector<8x256xf32>
    %95 = arith.addf %0, %94 : vector<8x256xf32>
    %c0_33 = arith.constant 0 : index
    %c0_34 = arith.constant 0 : index
    %96 = vector.load %arg11[%c0_33, %c0_34] : memref<1x256xf32, #tpu.memory_space<vmem>>, vector<1x256xf32>
    %97 = arith.mulf %95, %95 : vector<8x256xf32>
    %cst_35 = arith.constant dense<0.000000e+00> : vector<8xf32>
    %98 = vector.multi_reduction <add>, %97, %cst_35 [1] : vector<8x256xf32> to vector<8xf32>
    %99 = vector.shape_cast %98 : vector<8xf32> to vector<8x1xf32>
    %cst_36 = arith.constant 2.560000e+02 : f32
    %100 = vector.broadcast %cst_36 : f32 to vector<8x1xf32>
    %101 = arith.divf %99, %100 : vector<8x1xf32>
    %cst_37 = arith.constant 9.99999997E-7 : f32
    %102 = vector.broadcast %cst_37 : f32 to vector<8x1xf32>
    %103 = arith.addf %101, %102 : vector<8x1xf32>
    %104 = math.rsqrt %103 : vector<8x1xf32>
    %105 = vector.broadcast %104 : vector<8x1xf32> to vector<8x256xf32>
    %106 = arith.mulf %95, %105 : vector<8x256xf32>
    %107 = vector.broadcast %96 : vector<1x256xf32> to vector<8x256xf32>
    %108 = arith.mulf %106, %107 : vector<8x256xf32>
    %109 = arith.truncf %108 : vector<8x256xf32> to vector<8x256xbf16>
    %c0_38 = arith.constant 0 : index
    %c0_39 = arith.constant 0 : index
    %110 = vector.load %arg8[%c0_38, %c0_39] : memref<256x1024xbf16, #tpu.memory_space<vmem>>, vector<256x1024xbf16>
    %cst_40 = arith.constant dense<0.000000e+00> : vector<8x1024xf32>
    %111 = tpu.matmul %109, %110, %cst_40 {dimension_numbers = #tpu.dot_dimension_numbers<[1], [0], [0], [1], [0, 0, 1, 1], [], []>} : vector<8x256xbf16>, vector<256x1024xbf16>, vector<8x1024xf32> -> vector<8x1024xf32>
    %112 = vector.extract_strided_slice %111 {offsets = [0, 0], sizes = [8, 512], strides = [1, 1]} : vector<8x1024xf32> to vector<8x512xf32>
    %113 = vector.extract_strided_slice %111 {offsets = [0, 512], sizes = [8, 512], strides = [1, 1]} : vector<8x1024xf32> to vector<8x512xf32>
    %114 = arith.negf %112 : vector<8x512xf32>
    %115 = math.exp %114 : vector<8x512xf32>
    %cst_41 = arith.constant 1.000000e+00 : f32
    %116 = vector.broadcast %cst_41 : f32 to vector<8x512xf32>
    %117 = arith.addf %116, %115 : vector<8x512xf32>
    %118 = arith.divf %116, %117 : vector<8x512xf32>
    %119 = arith.mulf %112, %118 : vector<8x512xf32>
    %120 = arith.mulf %119, %113 : vector<8x512xf32>
    %121 = arith.truncf %120 : vector<8x512xf32> to vector<8x512xbf16>
    %c0_42 = arith.constant 0 : index
    %c0_43 = arith.constant 0 : index
    %122 = vector.load %arg9[%c0_42, %c0_43] : memref<512x256xbf16, #tpu.memory_space<vmem>>, vector<512x256xbf16>
    %cst_44 = arith.constant dense<0.000000e+00> : vector<8x256xf32>
    %123 = tpu.matmul %121, %122, %cst_44 {dimension_numbers = #tpu.dot_dimension_numbers<[1], [0], [0], [1], [0, 0, 1, 1], [], []>} : vector<8x512xbf16>, vector<512x256xbf16>, vector<8x256xf32> -> vector<8x256xf32>
    %124 = arith.addf %95, %123 : vector<8x256xf32>
    %125 = vector.extract_strided_slice %124 {offsets = [7, 0], sizes = [1, 256], strides = [1, 1]} : vector<8x256xf32> to vector<1x256xf32>
    %c0_45 = arith.constant 0 : index
    %c0_46 = arith.constant 0 : index
    %126 = vector.load %arg12[%c0_45, %c0_46] : memref<1x256xf32, #tpu.memory_space<vmem>>, vector<1x256xf32>
    %127 = arith.mulf %125, %125 : vector<1x256xf32>
    %cst_47 = arith.constant dense<0.000000e+00> : vector<1xf32>
    %128 = vector.multi_reduction <add>, %127, %cst_47 [1] : vector<1x256xf32> to vector<1xf32>
    %129 = vector.shape_cast %128 : vector<1xf32> to vector<1x1xf32>
    %cst_48 = arith.constant 2.560000e+02 : f32
    %130 = vector.broadcast %cst_48 : f32 to vector<1x1xf32>
    %131 = arith.divf %129, %130 : vector<1x1xf32>
    %cst_49 = arith.constant 9.99999997E-7 : f32
    %132 = vector.broadcast %cst_49 : f32 to vector<1x1xf32>
    %133 = arith.addf %131, %132 : vector<1x1xf32>
    %134 = math.rsqrt %133 : vector<1x1xf32>
    %135 = vector.broadcast %134 : vector<1x1xf32> to vector<1x256xf32>
    %136 = arith.mulf %125, %135 : vector<1x256xf32>
    %137 = arith.mulf %136, %126 : vector<1x256xf32>
    %c0_50 = arith.constant 0 : index
    %c0_51 = arith.constant 0 : index
    %138 = vector.load %arg13[%c0_50, %c0_51] : memref<1x256xf32, #tpu.memory_space<vmem>>, vector<1x256xf32>
    tpu.vector_store %arg13[%c0_50, %c0_51], %137 {strides = array<i32>} : memref<1x256xf32, #tpu.memory_space<vmem>>, vector<1x256xf32>,
    return
  }
  func.func @transform_0(%arg0: i32) -> (i32, i32) {
    %c0_i32 = arith.constant 0 : i32
    %c0_i32_0 = arith.constant 0 : i32
    %c0_i32_1 = arith.constant 0 : i32
    return %c0_i32, %c0_i32_0 : i32, i32
  }
  func.func @transform_1(%arg0: i32) -> (i32, i32) {
    %c0_i32 = arith.constant 0 : i32
    %c0_i32_0 = arith.constant 0 : i32
    %c0_i32_1 = arith.constant 0 : i32
    return %c0_i32, %c0_i32_0 : i32, i32
  }
  func.func @transform_2(%arg0: i32) -> (i32, i32) {
    %c0_i32 = arith.constant 0 : i32
    %c0_i32_0 = arith.constant 0 : i32
    %c0_i32_1 = arith.constant 0 : i32
    return %c0_i32, %c0_i32_0 : i32, i32
  }
  func.func @transform_3(%arg0: i32) -> (i32, i32) {
    %c0_i32 = arith.constant 0 : i32
    %c0_i32_0 = arith.constant 0 : i32
    %c0_i32_1 = arith.constant 0 : i32
    return %c0_i32, %c0_i32_0 : i32, i32
  }
  func.func @transform_4(%arg0: i32) -> (i32, i32) {
    %c0_i32 = arith.constant 0 : i32
    %c0_i32_0 = arith.constant 0 : i32
    %c0_i32_1 = arith.constant 0 : i32
    return %c0_i32, %c0_i32_0 : i32, i32
  }
  func.func @transform_5(%arg0: i32) -> (i32, i32) {
    %c0_i32 = arith.constant 0 : i32
    %c0_i32_0 = arith.constant 0 : i32
    %c0_i32_1 = arith.constant 0 : i32
    return %c0_i32, %c0_i32_0 : i32, i32
  }
  func.func @transform_6(%arg0: i32) -> (i32, i32) {
    %c0_i32 = arith.constant 0 : i32
    %c0_i32_0 = arith.constant 0 : i32
    %c0_i32_1 = arith.constant 0 : i32
    return %c0_i32, %c0_i32_0 : i32, i32
  }
  func.func @transform_7(%arg0: i32) -> (i32, i32) {
    %c0_i32 = arith.constant 0 : i32
    %c0_i32_0 = arith.constant 0 : i32
    %c0_i32_1 = arith.constant 0 : i32
    return %c0_i32, %c0_i32_0 : i32, i32
  }
  func.func @transform_8(%arg0: i32) -> (i32, i32) {
    %c0_i32 = arith.constant 0 : i32
    %c0_i32_0 = arith.constant 0 : i32
    %c0_i32_1 = arith.constant 0 : i32
    return %c0_i32, %c0_i32_0 : i32, i32
  }
  func.func @transform_9(%arg0: i32) -> (i32, i32) {
    %c0_i32 = arith.constant 0 : i32
    %c0_i32_0 = arith.constant 0 : i32
    %c0_i32_1 = arith.constant 0 : i32
    return %c0_i32, %c0_i32_0 : i32, i32
  }
  func.func @transform_10(%arg0: i32) -> (i32, i32) {
    %c0_i32 = arith.constant 0 : i32
    %c0_i32_0 = arith.constant 0 : i32
    %c0_i32_1 = arith.constant 0 : i32
    return %c0_i32, %c0_i32_0 : i32, i32
  }
  func.func @transform_11(%arg0: i32) -> (i32, i32) {
    %c0_i32 = arith.constant 0 : i32
    %c0_i32_0 = arith.constant 0 : i32
    %c0_i32_1 = arith.constant 0 : i32
    return %c0_i32, %c0_i32_0 : i32, i32
  }
  func.func @transform_12(%arg0: i32) -> (i32, i32) {
    %c0_i32 = arith.constant 0 : i32
    %c0_i32_0 = arith.constant 0 : i32
    %c0_i32_1 = arith.constant 0 : i32
    return %c0_i32, %c0_i32_0 : i32, i32
  }
}

</mosaic_0001>

<bundles_post_ra>
// kernel: tpu_custom_call.1
= control target key start
LH: loop header
LB: loop body
LE: loop exit
PB: predicated region body
PF: predicated region fallthrough
CT: control target
= control target key end

     0   :  { %17 = vsyncpa [#allocation4], 0  ;;  %s4721_s0 = inlined_call_operand.hbm [shape: f32[8,256], index: 0, kind: input, shape index: {}]   ;;  %s4722_s1 = inlined_call_operand.hbm [shape: f32[8,8], index: 1, kind: input, shape index: {}]   ;;  %s4723_s2 = inlined_call_operand.hbm [shape: f32[8,128], index: 2, kind: input, shape index: {}]   ;;  %s4724_s3 = inlined_call_operand.hbm [shape: f32[8,128], index: 3, kind: input, shape index: {}]   ;;  %s4725_s4 = inlined_call_operand.hbm [shape: bf16[256,512], index: 4, kind: input, shape index: {}]   ;;  %s4726_s5 = inlined_call_operand.vmem [shape: f32[1,512], index: 5, kind: input, shape index: {}]   ;;  %s4727_s6 = inlined_call_operand.hbm [shape: bf16[256,256], index: 6, kind: input, shape index: {}]   ;;  %s4728_s7 = inlined_call_operand.hbm [shape: bf16[256,1024], index: 7, kind: input, shape index: {}]   ;;  %s4729_s8 = inlined_call_operand.hbm [shape: bf16[512,256], index: 8, kind: input, shape index: {}]   ;;  %s4730_s9 = inlined_call_operand.vmem [shape: f32[1,256], index: 9, kind: input, shape index: {}]   ;;  %s4731_s10 = inlined_call_operand.vmem [shape: f32[1,256], index: 10, kind: input, shape index: {}]   ;;  %s4732_s11 = inlined_call_operand.vmem [shape: f32[1,256], index: 11, kind: input, shape index: {}]   ;;  %s4733_s12 = inlined_call_operand.hbm [shape: f32[1,256], index: 12, kind: output, shape index: {}]  }
   0x1   :  { %18 = vsyncpa [#allocation7], 0 }
   0x2   :  { %19 = vsyncpa [#allocation10], 0 }
   0x3   :  { %20 = vsyncpa [#allocation13], 0 }
   0x4   :  { %21 = vsyncpa [#allocation16], 0  ;;  %s39_s23 = sshll.u32 %s4722_s1, 4  ;;  %s40_s23 = int_to_ptr.hbm [resolvable:$true] %s39_s23 }
   0x5   :  { %22 = vsyncpa [#allocation5], 0  ;;  %s4442_s24 = smov [#allocation6]   ;;  %s61_s28 = sshll.u32 %s4724_s3, 4  ;;  %s62_s28 = int_to_ptr.hbm [resolvable:$true] %s61_s28 }
   0x6   :  { %s41_s25 = sshll.u32 %s4442_s24, 4  ;;  %s4443_s29 = smov [#allocation9]   ;;  %s42_s25 = int_to_ptr.vmem [resolvable:$true] %s41_s25 }
   0x7   :  { %44 = dma.hbm_to_vmem [thread:$0]  %s40_s23, 128, %s42_s25, [#allocation7]  }
   0x8   :  { %s63_s30 = sshll.u32 %s4443_s29, 4  ;;  %s86_s15 = sshll.u32 %s4727_s6, 4  ;;  %s64_s30 = int_to_ptr.vmem [resolvable:$true] %s63_s30  ;;  %s87_s15 = int_to_ptr.hbm [resolvable:$true] %s86_s15 }
   0x9   :  { %66 = dma.hbm_to_vmem [thread:$0]  %s62_s28, 128, %s64_s30, [#allocation10]  }
   0xa   :  { %s4444_s1 = smov [#allocation12]   ;;  %s28_s19 = sshll.u32 %s4721_s0, 4  ;;  %s29_s19 = int_to_ptr.hbm [resolvable:$true] %s28_s19 }
   0xb   :  { %s88_s16 = sshll.u32 %s4444_s1, 4  ;;  %s4445_s20 = smov 128   ;;  %s89_s16 = int_to_ptr.vmem [resolvable:$true] %s88_s16 }
   0xc   :  { %s4446_s3 = smov 8   ;;  %s4447_s21 = smov [#allocation3]  }
   0xd   :  { %94 = dma.hbm_to_vmem [thread:$0]  %s87_s15, 4096, %s89_s16, [#allocation13], %s4445_s20, %s4445_s20, %s4446_s3  }
   0xe   :  { %s30_s22 = sshll.u32 %s4447_s21, 4  ;;  %s50_s24 = sshll.u32 %s4723_s2, 4  ;;  %s31_s22 = int_to_ptr.vmem [resolvable:$true] %s30_s22  ;;  %s51_s24 = int_to_ptr.hbm [resolvable:$true] %s50_s24 }
   0xf   :  { %33 = dma.hbm_to_vmem [thread:$0]  %s29_s19, 256, %s31_s22, [#allocation4]  }
  0x10   :  { %s71_s0 = sshll.u32 %s4725_s4, 4  ;;  %s4448_s27 = smov [#allocation8]   ;;  %s72_s0 = int_to_ptr.hbm [resolvable:$true] %s71_s0 }
  0x11   :  { %s52_s28 = sshll.u32 %s4448_s27, 4  ;;  %s4449_s29 = smov [#allocation11]   ;;  %s53_s28 = int_to_ptr.vmem [resolvable:$true] %s52_s28 }
  0x12   :  { %55 = dma.hbm_to_vmem [thread:$0]  %s51_s24, 128, %s53_s28, [#allocation7]  }
  0x13   :  { %s73_s30 = sshll.u32 %s4449_s29, 4  ;;  %s4450_s13 = smov 256   ;;  %s74_s30 = int_to_ptr.vmem [resolvable:$true] %s73_s30 }
  0x14   :  { %s4451_s14 = smov 16   ;;  %s99_s1 = sshll.u32 %s4728_s7, 4  ;;  %s100_s1 = int_to_ptr.hbm [resolvable:$true] %s99_s1 }
  0x15   :  { %79 = dma.hbm_to_vmem [thread:$0]  %s72_s0, 8192, %s74_s30, [#allocation10], %s4450_s13, %s4450_s13, %s4451_s14  }
  0x16   :  { %s4452_s16 = smov [#allocation14]   ;;  %s112_s19 = sshll.u32 %s4729_s8, 4  ;;  %s113_s19 = int_to_ptr.hbm [resolvable:$true] %s112_s19 }
  0x17   :  { %s101_s17 = sshll.u32 %s4452_s16, 4  ;;  %s4453_s21 = smov 512   ;;  %s102_s17 = int_to_ptr.vmem [resolvable:$true] %s101_s17 }
  0x18   :  { %s4454_s22 = smov 32   ;;  %s4455_s6 = smov [#allocation15]  }
  0x19   :  { %107 = dma.hbm_to_vmem [thread:$0]  %s100_s1, 16384, %s102_s17, [#allocation13], %s4453_s21, %s4453_s21, %s4454_s22  }
  0x1a   :  { %s114_s23 = sshll.u32 %s4455_s6, 4  ;;  %s115_s23 = int_to_ptr.vmem [resolvable:$true] %s114_s23 }
  0x1b   :  { %120 = dma.hbm_to_vmem [thread:$0]  %s113_s19, 8192, %s115_s23, [#allocation16], %s4445_s20, %s4445_s20, %s4446_s3  }
  0x1c   :  { %4430 = dma.done.wait [#allocation4], 256  }
  0x1d   :  { %4431 = vsyncadd [#allocation4], 4294967040 }
  0x1e   :  { %4432 = dma.done.wait [#allocation7], 256  }
  0x1f   :  { %4433 = vsyncadd [#allocation7], 4294967040 }
  0x20   :  { %4434 = dma.done.wait [#allocation10], 8320  }
  0x21   :  { %4435 = vsyncadd [#allocation10], 4294958976 }
  0x22   :  { %4436 = dma.done.wait [#allocation13], 20480  }
  0x23   :  { %4437 = vsyncadd [#allocation13], 4294946816 }
  0x24   :  { %4438 = dma.done.wait [#allocation16], 8192  }
  0x25   :  { %4439 = vsyncadd [#allocation16], 4294959104  ;;  %v4554_v0 = vld [vmem:[#allocation3] sm:$0xff]  ;;  %v4556_v1 = vld [vmem:[#allocation3 + $0x8] sm:$0xff]  ;;  %v4456_v60 = vmov 256.0   ;;  %s4457_s3 = smov 64  }
  0x26   :  { %v2831_v2 = vld [vmem:[#allocation11 + $0xe0] sm:$0xf]  ;;  %v163_v3 = vmul.f32 %v4554_v0, %v4554_v0  ;;  %v164_v4 = vmul.f32 %v4556_v1, %v4556_v1  ;;  %v3905_v5 = vld [vmem:[#allocation11 + $0xec] sm:$0xf0]  ;;  %v3903_v10 = vld [vmem:[#allocation11 + $0xe4] sm:$0xf]  ;;  %4180 = vrcp.f32 %v4456_v60 }
  0x27   :  { %v2959_v6 = vld [vmem:[#allocation11 + $0x1e0] sm:$0xf]  ;;  %v3937_v7 = vld [vmem:[#allocation11 + $0x1ec] sm:$0xf0]  ;;  %v2832_v8 = vor.u32 %v3905_v5, %v2831_v2  ;;  %v2833_v11 = vld [vmem:[#allocation11 + $0xf0] sm:$0xf0] }
  0x28   :  { %v2960_v9 = vor.u32 %v3937_v7, %v2959_v6  ;;  %v3935_v12 = vld [vmem:[#allocation11 + $0x1e4] sm:$0xf]  ;;  %v165_v13 = vadd.f32 %v164_v4, %v163_v3  ;;  %v2836_v14 = vor.u32 %v3903_v10, %v2833_v11  ;;  %v2961_v15 = vld [vmem:[#allocation11 + $0x1f0] sm:$0xf0]  ;;  %v2815_v16 = vld [vmem:[#allocation11 + $0xc0] sm:$0xf] }
  0x29   :  { %v3901_v17 = vld [vmem:[#allocation11 + $0xcc] sm:$0xf0]  ;;  %592 = vmatpush.bf16.msra.mxu0 %v2832_v8  ;;  %v2964_v18 = vor.u32 %v3935_v12, %v2961_v15  ;;  %v2943_v20 = vld [vmem:[#allocation11 + $0x1c0] sm:$0xf]  ;;  %v3899_v22 = vld [vmem:[#allocation11 + $0xc4] sm:$0xf] }
  0x2a   :  { %605 = vmatpush.bf16.msra.mxu1 %v2960_v9  ;;  %v2816_v19 = vor.u32 %v3901_v17, %v2815_v16  ;;  %v3933_v21 = vld [vmem:[#allocation11 + $0x1cc] sm:$0xf0]  ;;  %166 = vadd.xlane.f32.xlu0 %v165_v13  ;;  %v2817_v24 = vld [vmem:[#allocation11 + $0xd0] sm:$0xf0]  ;;  %v3931_v25 = vld [vmem:[#allocation11 + $0x1c4] sm:$0xf] }
  0x2b   :  { %618 = vmatpush.bf16.msra.mxu2 %v2836_v14  ;;  %v2944_v23 = vor.u32 %v3933_v21, %v2943_v20  ;;  %v2945_v26 = vld [vmem:[#allocation11 + $0x1d0] sm:$0xf0]  ;;  %631 = vmatpush.bf16.msra.mxu3 %v2964_v18  ;;  %v2820_v27 = vor.u32 %v3899_v22, %v2817_v24  ;;  %v2799_v29 = vld [vmem:[#allocation11 + $0xa0] sm:$0xf]  ;;  %v3897_v30 = vld [vmem:[#allocation11 + $0xac] sm:$0xf0] }
  0x2c   :  { %v2948_v28 = vor.u32 %v3931_v25, %v2945_v26  ;;  %v2927_v31 = vld [vmem:[#allocation11 + $0x1a0] sm:$0xf]  ;;  %v3929_v32 = vld [vmem:[#allocation11 + $0x1ac] sm:$0xf0]  ;;  %v3895_v33 = vld [vmem:[#allocation11 + $0xa4] sm:$0xf]  ;;  %v2800_v35 = vor.u32 %v3897_v30, %v2799_v29  ;;  %v4562_v16 = vpop.eup %4180 }
  0x2d   :  { %v2801_v34 = vld [vmem:[#allocation11 + $0xb0] sm:$0xf0]  ;;  %593 = vmatpush.bf16.msra.mxu0 %v2816_v19  ;;  %v2928_v36 = vor.u32 %v3929_v32, %v2927_v31  ;;  %v3927_v37 = vld [vmem:[#allocation11 + $0x1a4] sm:$0xf]  ;;  %v2783_v39 = vld [vmem:[#allocation11 + $0x80] sm:$0xf]  ;;  %vm173_vm0 = vweird.f32 %v4562_v16 }
  0x2e   :  { %606 = vmatpush.bf16.msra.mxu1 %v2944_v23  ;;  %v2929_v38 = vld [vmem:[#allocation11 + $0x1b0] sm:$0xf0]  ;;  %v2804_v40 = vor.u32 %v3895_v33, %v2801_v34  ;;  %v3893_v41 = vld [vmem:[#allocation11 + $0x8c] sm:$0xf0]  ;;  %v2911_v42 = vld [vmem:[#allocation11 + $0x180] sm:$0xf] }
  0x2f   :  { %619 = vmatpush.bf16.msra.mxu2 %v2820_v27  ;;  %v3925_v43 = vld [vmem:[#allocation11 + $0x18c] sm:$0xf0]  ;;  %632 = vmatpush.bf16.msra.mxu3 %v2948_v28  ;;  %v2932_v44 = vor.u32 %v3927_v37, %v2929_v38  ;;  %v3891_v45 = vld [vmem:[#allocation11 + $0x84] sm:$0xf]  ;;  %v2785_v46 = vld [vmem:[#allocation11 + $0x90] sm:$0xf0]  ;;  %v2784_v49 = vor.u32 %v3893_v41, %v2783_v39 }
  0x30   :  { %v3923_v47 = vld [vmem:[#allocation11 + $0x184] sm:$0xf]  ;;  %v2913_v48 = vld [vmem:[#allocation11 + $0x190] sm:$0xf0]  ;;  %v2912_v50 = vor.u32 %v3925_v43, %v2911_v42  ;;  %v2788_v51 = vor.u32 %v3891_v45, %v2785_v46  ;;  %v2767_v53 = vld [vmem:[#allocation11 + $0x60] sm:$0xf] }
  0x31   :  { %594 = vmatpush.bf16.msra.mxu0 %v2800_v35  ;;  %v2916_v52 = vor.u32 %v3923_v47, %v2913_v48  ;;  %v3889_v54 = vld [vmem:[#allocation11 + $0x6c] sm:$0xf0]  ;;  %v2895_v55 = vld [vmem:[#allocation11 + $0x160] sm:$0xf]  ;;  %v3887_v58 = vld [vmem:[#allocation11 + $0x64] sm:$0xf] }
  0x32   :  { %607 = vmatpush.bf16.msra.mxu1 %v2928_v36  ;;  %v2768_v56 = vor.u32 %v3889_v54, %v2767_v53  ;;  %v3921_v57 = vld [vmem:[#allocation11 + $0x16c] sm:$0xf0]  ;;  %v2769_v59 = vld [vmem:[#allocation11 + $0x70] sm:$0xf0]  ;;  %v3919_v63 = vld [vmem:[#allocation11 + $0x164] sm:$0xf] }
  0x33   :  { %620 = vmatpush.bf16.msra.mxu2 %v2804_v40  ;;  %633 = vmatpush.bf16.msra.mxu3 %v2932_v44  ;;  %v2896_v61 = vor.u32 %v3921_v57, %v2895_v55  ;;  %v2772_v62 = vor.u32 %v3887_v58, %v2769_v59  ;;  %v2897_v2 = vld [vmem:[#allocation11 + $0x170] sm:$0xf0]  ;;  %v2751_v4 = vld [vmem:[#allocation11 + $0x40] sm:$0xf]  ;;  %v3885_v5 = vld [vmem:[#allocation11 + $0x4c] sm:$0xf0] }
  0x34   :  { %v2900_v3 = vor.u32 %v3919_v63, %v2897_v2  ;;  %v2879_v6 = vld [vmem:[#allocation11 + $0x140] sm:$0xf]  ;;  %v2752_v7 = vor.u32 %v3885_v5, %v2751_v4  ;;  %v3917_v8 = vld [vmem:[#allocation11 + $0x14c] sm:$0xf0]  ;;  %v3883_v9 = vld [vmem:[#allocation11 + $0x44] sm:$0xf] }
  0x35   :  { %595 = vmatpush.bf16.msra.mxu0 %v2784_v49  ;;  %v2753_v10 = vld [vmem:[#allocation11 + $0x50] sm:$0xf0]  ;;  %v2880_v11 = vor.u32 %v3917_v8, %v2879_v6  ;;  %v3915_v13 = vld [vmem:[#allocation11 + $0x144] sm:$0xf]  ;;  %v2735_v17 = vld [vmem:[#allocation11 + $0x20] sm:$0xf] }
  0x36   :  { %608 = vmatpush.bf16.msra.mxu1 %v2912_v50  ;;  %v2756_v12 = vor.u32 %v3883_v9, %v2753_v10  ;;  %v2881_v14 = vld [vmem:[#allocation11 + $0x150] sm:$0xf0]  ;;  %v3881_v18 = vld [vmem:[#allocation11 + $0x2c] sm:$0xf0]  ;;  %v2863_v19 = vld [vmem:[#allocation11 + $0x120] sm:$0xf] }
  0x37   :  { %621 = vmatpush.bf16.msra.mxu2 %v2788_v51  ;;  %634 = vmatpush.bf16.msra.mxu3 %v2916_v52  ;;  %v2884_v15 = vor.u32 %v3915_v13, %v2881_v14  ;;  %v2736_v20 = vor.u32 %v3881_v18, %v2735_v17  ;;  %v3913_v21 = vld [vmem:[#allocation11 + $0x12c] sm:$0xf0]  ;;  %v3879_v22 = vld [vmem:[#allocation11 + $0x24] sm:$0xf]  ;;  %v2737_v23 = vld [vmem:[#allocation11 + $0x30] sm:$0xf0] }
  0x38   :  { %v2864_v24 = vor.u32 %v3913_v21, %v2863_v19  ;;  %v2740_v25 = vor.u32 %v3879_v22, %v2737_v23  ;;  %v3911_v26 = vld [vmem:[#allocation11 + $0x124] sm:$0xf]  ;;  %v2865_v27 = vld [vmem:[#allocation11 + $0x130] sm:$0xf0]  ;;  %v4565_v28 = vmul.f32 256.0, %v4562_v16  ;;  %vm747_vm4 = vcmask 1043456  }
  0x39   :  { %596 = vmatpush.bf16.msra.mxu0 %v2768_v56  ;;  %v2868_v29 = vor.u32 %v3911_v26, %v2865_v27  ;;  %v2719_v30 = vld [vmem:[#allocation11] sm:$0xf]  ;;  %v3877_v31 = vld [vmem:[#allocation11 + $0xc] sm:$0xf0]  ;;  %v3875_v35 = vld [vmem:[#allocation11 + $0x4] sm:$0xf] }
  0x3a   :  { %609 = vmatpush.bf16.msra.mxu1 %v2896_v61  ;;  %v2847_v32 = vld [vmem:[#allocation11 + $0x100] sm:$0xf]  ;;  %v2720_v33 = vor.u32 %v3877_v31, %v2719_v30  ;;  %v3909_v34 = vld [vmem:[#allocation11 + $0x10c] sm:$0xf0]  ;;  %v2721_v36 = vld [vmem:[#allocation11 + $0x10] sm:$0xf0] }
  0x3b   :  { %622 = vmatpush.bf16.msra.mxu2 %v2772_v62  ;;  %635 = vmatpush.bf16.msra.mxu3 %v2900_v3  ;;  %v2848_v37 = vor.u32 %v3909_v34, %v2847_v32  ;;  %v2724_v38 = vor.u32 %v3875_v35, %v2721_v36  ;;  %v3907_v39 = vld [vmem:[#allocation11 + $0x104] sm:$0xf]  ;;  %v2849_v40 = vld [vmem:[#allocation11 + $0x110] sm:$0xf0]  ;;  %v2839_v41 = vld [vmem:[#allocation11 + $0xe8] sm:$0xf] }
  0x3c   :  { %v2852_v42 = vor.u32 %v3907_v39, %v2849_v40  ;;  %v3906_v43 = vld [vmem:[#allocation11 + $0xf4] sm:$0xf0]  ;;  %v2967_v44 = vld [vmem:[#allocation11 + $0x1e8] sm:$0xf]  ;;  %v3904_v48 = vld [vmem:[#allocation11 + $0xec] sm:$0xf] }
  0x3d   :  { %597 = vmatpush.bf16.msra.mxu0 %v2752_v7  ;;  %v3938_v45 = vld [vmem:[#allocation11 + $0x1f4] sm:$0xf0]  ;;  %v2840_v46 = vor.u32 %v3906_v43, %v2839_v41  ;;  %v2841_v49 = vld [vmem:[#allocation11 + $0xf8] sm:$0xf0]  ;;  %v3936_v50 = vld [vmem:[#allocation11 + $0x1ec] sm:$0xf] }
  0x3e   :  { %610 = vmatpush.bf16.msra.mxu1 %v2880_v11  ;;  %v2968_v47 = vor.u32 %v3938_v45, %v2967_v44  ;;  %v2844_v51 = vor.u32 %v3904_v48, %v2841_v49  ;;  %v2969_v52 = vld [vmem:[#allocation11 + $0x1f8] sm:$0xf0]  ;;  %v2823_v53 = vld [vmem:[#allocation11 + $0xc8] sm:$0xf]  ;;  %v3902_v54 = vld [vmem:[#allocation11 + $0xd4] sm:$0xf0] }
  0x3f   :  { %623 = vmatpush.bf16.msra.mxu2 %v2756_v12  ;;  %636 = vmatpush.bf16.msra.mxu3 %v2884_v15  ;;  %v2972_v55 = vor.u32 %v3936_v50, %v2969_v52  ;;  %v2824_v56 = vor.u32 %v3902_v54, %v2823_v53  ;;  %v2951_v57 = vld [vmem:[#allocation11 + $0x1c8] sm:$0xf]  ;;  %v3934_v58 = vld [vmem:[#allocation11 + $0x1d4] sm:$0xf0]  ;;  %v3900_v59 = vld [vmem:[#allocation11 + $0xcc] sm:$0xf] }
  0x40   :  { %v2952_v60 = vor.u32 %v3934_v58, %v2951_v57  ;;  %v2825_v61 = vld [vmem:[#allocation11 + $0xd8] sm:$0xf0]  ;;  %v3932_v62 = vld [vmem:[#allocation11 + $0x1cc] sm:$0xf]  ;;  %v170_v2 = vsub.f32 1.0, %v4565_v28  ;;  %vm730_vm5 = vcmask 64512  }
  0x41   :  { %598 = vmatpush.bf16.msra.mxu0 %v2736_v20  ;;  %v2953_v63 = vld [vmem:[#allocation11 + $0x1d8] sm:$0xf0]  ;;  %v2828_v3 = vor.u32 %v3900_v59, %v2825_v61  ;;  %v2807_v5 = vld [vmem:[#allocation11 + $0xa8] sm:$0xf]  ;;  %v3898_v6 = vld [vmem:[#allocation11 + $0xb4] sm:$0xf0] }
  0x42   :  { %611 = vmatpush.bf16.msra.mxu1 %v2864_v24  ;;  %v2956_v4 = vor.u32 %v3932_v62, %v2953_v63  ;;  %v2935_v7 = vld [vmem:[#allocation11 + $0x1a8] sm:$0xf]  ;;  %v2808_v8 = vor.u32 %v3898_v6, %v2807_v5  ;;  %v3930_v9 = vld [vmem:[#allocation11 + $0x1b4] sm:$0xf0]  ;;  %v3896_v10 = vld [vmem:[#allocation11 + $0xac] sm:$0xf]  ;;  %v171_v17 = vmul.f32 %v4562_v16, %v170_v2 }
  0x43   :  { %624 = vmatpush.bf16.msra.mxu2 %v2740_v25  ;;  %637 = vmatpush.bf16.msra.mxu3 %v2868_v29  ;;  %v2809_v11 = vld [vmem:[#allocation11 + $0xb8] sm:$0xf0]  ;;  %v2936_v12 = vor.u32 %v3930_v9, %v2935_v7  ;;  %v3928_v14 = vld [vmem:[#allocation11 + $0x1ac] sm:$0xf]  ;;  %v2791_v19 = vld [vmem:[#allocation11 + $0x88] sm:$0xf] }
  0x44   :  { %v2812_v13 = vor.u32 %v3896_v10, %v2809_v11  ;;  %v2937_v15 = vld [vmem:[#allocation11 + $0x1b8] sm:$0xf0]  ;;  %v3894_v20 = vld [vmem:[#allocation11 + $0x94] sm:$0xf0]  ;;  %v2919_v21 = vld [vmem:[#allocation11 + $0x188] sm:$0xf]  ;;  %v172_v30 = vadd.f32 %v4562_v16, %v171_v17 }
  0x45   :  { %599 = vmatpush.bf16.msra.mxu0 %v2720_v33  ;;  %v2940_v18 = vor.u32 %v3928_v14, %v2937_v15  ;;  %v2792_v22 = vor.u32 %v3894_v20, %v2791_v19  ;;  %v3926_v23 = vld [vmem:[#allocation11 + $0x194] sm:$0xf0]  ;;  %v3892_v24 = vld [vmem:[#allocation11 + $0x8c] sm:$0xf]  ;;  %v2793_v25 = vld [vmem:[#allocation11 + $0x98] sm:$0xf0] }
  0x46   :  { %612 = vmatpush.bf16.msra.mxu1 %v2848_v37  ;;  %v2920_v26 = vor.u32 %v3926_v23, %v2919_v21  ;;  %v2796_v27 = vor.u32 %v3892_v24, %v2793_v25  ;;  %v3924_v28 = vld [vmem:[#allocation11 + $0x18c] sm:$0xf]  ;;  %v2921_v29 = vld [vmem:[#allocation11 + $0x198] sm:$0xf0]  ;;  %v2775_v32 = vld [vmem:[#allocation11 + $0x68] sm:$0xf]  ;;  %v4572_v39 = vsel %vm173_vm0, %v4562_v16, %v172_v30 }
  0x47   :  { %625 = vmatpush.bf16.msra.mxu2 %v2724_v38  ;;  %638 = vmatpush.bf16.msra.mxu3 %v2852_v42  ;;  %v2924_v31 = vor.u32 %v3924_v28, %v2921_v29  ;;  %v3890_v33 = vld [vmem:[#allocation11 + $0x74] sm:$0xf0]  ;;  %v2903_v34 = vld [vmem:[#allocation11 + $0x168] sm:$0xf]  ;;  %v3888_v37 = vld [vmem:[#allocation11 + $0x6c] sm:$0xf] }
  0x48   :  { %v2776_v35 = vor.u32 %v3890_v33, %v2775_v32  ;;  %v3922_v36 = vld [vmem:[#allocation11 + $0x174] sm:$0xf0]  ;;  %v2777_v38 = vld [vmem:[#allocation11 + $0x78] sm:$0xf0]  ;;  %v3920_v42 = vld [vmem:[#allocation11 + $0x16c] sm:$0xf] }
  0x49   :  { %644 = vmatpush.bf16.msrb.mxu0 %v2840_v46  ;;  %v2904_v40 = vor.u32 %v3922_v36, %v2903_v34  ;;  %v2780_v41 = vor.u32 %v3888_v37, %v2777_v38  ;;  %v2905_v43 = vld [vmem:[#allocation11 + $0x178] sm:$0xf0]  ;;  %v2759_v44 = vld [vmem:[#allocation11 + $0x48] sm:$0xf]  ;;  %v3886_v46 = vld [vmem:[#allocation11 + $0x54] sm:$0xf0] }
  0x4a   :  { %657 = vmatpush.bf16.msrb.mxu1 %v2968_v47  ;;  %v2908_v45 = vor.u32 %v3920_v42, %v2905_v43  ;;  %v2887_v47 = vld [vmem:[#allocation11 + $0x148] sm:$0xf]  ;;  %v3918_v48 = vld [vmem:[#allocation11 + $0x154] sm:$0xf0]  ;;  %v2760_v50 = vor.u32 %v3886_v46, %v2759_v44  ;;  %v3884_v52 = vld [vmem:[#allocation11 + $0x4c] sm:$0xf] }
  0x4b   :  { %670 = vmatpush.bf16.msrb.mxu2 %v2844_v51  ;;  %683 = vmatpush.bf16.msrb.mxu3 %v2972_v55  ;;  %v2888_v51 = vor.u32 %v3918_v48, %v2887_v47  ;;  %v2761_v53 = vld [vmem:[#allocation11 + $0x58] sm:$0xf0]  ;;  %v3916_v54 = vld [vmem:[#allocation11 + $0x14c] sm:$0xf]  ;;  %v2743_v57 = vld [vmem:[#allocation11 + $0x28] sm:$0xf] }
  0x4c   :  { %v2764_v55 = vor.u32 %v3884_v52, %v2761_v53  ;;  %v3882_v58 = vld [vmem:[#allocation11 + $0x34] sm:$0xf0]  ;;  %v3880_v62 = vld [vmem:[#allocation11 + $0x2c] sm:$0xf]  ;;  %v2745_v2 = vld [vmem:[#allocation11 + $0x38] sm:$0xf0] }
  0x4d   :  { %645 = vmatpush.bf16.msrb.mxu0 %v2824_v56  ;;  %v2889_v56 = vld [vmem:[#allocation11 + $0x158] sm:$0xf0]  ;;  %v3914_v61 = vld [vmem:[#allocation11 + $0x134] sm:$0xf0]  ;;  %v2727_v7 = vld [vmem:[#allocation11 + $0x8] sm:$0xf] }
  0x4e   :  { %658 = vmatpush.bf16.msrb.mxu1 %v2952_v60  ;;  %v2892_v59 = vor.u32 %v3916_v54, %v2889_v56  ;;  %v2871_v60 = vld [vmem:[#allocation11 + $0x128] sm:$0xf]  ;;  %v2873_v6 = vld [vmem:[#allocation11 + $0x138] sm:$0xf0]  ;;  %v3878_v9 = vld [vmem:[#allocation11 + $0x14] sm:$0xf0] }
  0x4f   :  { %671 = vmatpush.bf16.msrb.mxu2 %v2828_v3  ;;  %684 = vmatpush.bf16.msrb.mxu3 %v2956_v4  ;;  %v3912_v3 = vld [vmem:[#allocation11 + $0x12c] sm:$0xf]  ;;  %v2744_v4 = vor.u32 %v3882_v58, %v2743_v57  ;;  %v2872_v5 = vor.u32 %v3914_v61, %v2871_v60  ;;  %v2855_v10 = vld [vmem:[#allocation11 + $0x108] sm:$0xf]  ;;  %v3910_v11 = vld [vmem:[#allocation11 + $0x114] sm:$0xf0] }
  0x50   :  { %v2729_v14 = vld [vmem:[#allocation11 + $0x18] sm:$0xf0]  ;;  %v3908_v15 = vld [vmem:[#allocation11 + $0x10c] sm:$0xf]  ;;  %v2856_v19 = vor.u32 %v3910_v11, %v2855_v10  ;;  %s4458_s26 = smov [#allocation17]  }
  0x51   :  { %646 = vmatpush.bf16.msrb.mxu0 %v2808_v8  ;;  %v2748_v8 = vor.u32 %v3880_v62, %v2745_v2  ;;  %v2857_v17 = vld [vmem:[#allocation11 + $0x118] sm:$0xf0]  ;;  %s2701_s0 = sshll.u32 %s4458_s26, 4  ;;  %s2702_s0 = int_to_ptr.vmem [resolvable:$true] %s2701_s0 }
  0x52   :  { %659 = vmatpush.bf16.msrb.mxu1 %v2936_v12  ;;  %v2876_v12 = vor.u32 %v3912_v3, %v2873_v6  ;;  %v2860_v21 = vor.u32 %v3908_v15, %v2857_v17 }
  0x53   :  { %672 = vmatpush.bf16.msrb.mxu2 %v2812_v13  ;;  %685 = vmatpush.bf16.msrb.mxu3 %v2940_v18  ;;  %v3876_v13 = vld [vmem:[#allocation11 + $0xc] sm:$0xf]  ;;  %v2728_v18 = vor.u32 %v3878_v9, %v2727_v7  ;;  %v699_v9 = vld [vmem:[#allocation9] sm:$0xff] }
  0x54   :  { %v2732_v20 = vor.u32 %v3876_v13, %v2729_v14 }
  0x55   :  { %647 = vmatpush.bf16.msrb.mxu0 %v2792_v22 }
  0x56   :  { %660 = vmatpush.bf16.msrb.mxu1 %v2920_v26 }
  0x57   :  { %673 = vmatpush.bf16.msrb.mxu2 %v2796_v27  ;;  %686 = vmatpush.bf16.msrb.mxu3 %v2924_v31  ;;  %v162_v27 = vld [vmem:[%s4730_s9] sm:$0x3] }
  0x58   :  { %v190_v29 = vperm.slane %v162_v27, 0  ;;  %v191_v30 = vperm.slane %v162_v27, 1 }
  0x59   :  { %648 = vmatpush.bf16.msrb.mxu0 %v2776_v35 }
  0x5a   :  { %661 = vmatpush.bf16.msrb.mxu1 %v2904_v40 }
  0x5b   :  { %674 = vmatpush.bf16.msrb.mxu2 %v2780_v41  ;;  %687 = vmatpush.bf16.msrb.mxu3 %v2908_v45 }
  0x5d   :  { %649 = vmatpush.bf16.msrb.mxu0 %v2760_v50 }
  0x5e   :  { %662 = vmatpush.bf16.msrb.mxu1 %v2888_v51 }
  0x5f   :  { %675 = vmatpush.bf16.msrb.mxu2 %v2764_v55  ;;  %688 = vmatpush.bf16.msrb.mxu3 %v2892_v59 }
  0x61   :  { %650 = vmatpush.bf16.msrb.mxu0 %v2744_v4 }
  0x62   :  { %663 = vmatpush.bf16.msrb.mxu1 %v2872_v5 }
  0x63   :  { %676 = vmatpush.bf16.msrb.mxu2 %v2748_v8  ;;  %689 = vmatpush.bf16.msrb.mxu3 %v2876_v12  ;;  %v698_v8 = vld [vmem:[#allocation8] sm:$0xff] }
  0x65   :  { %651 = vmatpush.bf16.msrb.mxu0 %v2728_v18 }
  0x66   :  { %664 = vmatpush.bf16.msrb.mxu1 %v2856_v19 }
  0x67   :  { %677 = vmatpush.bf16.msrb.mxu2 %v2732_v20  ;;  %690 = vmatpush.bf16.msrb.mxu3 %v2860_v21 }
  0x9d   :  { %v167_v49 = vpop.xlane.xlu0 %166 }
  0x9e   :  { %v175_v16 = vmul.f32 %v4572_v39, %v167_v49 }
  0xa0   :  { %v176_v63 = vadd.f32 1e-06, %v175_v16 }
  0xa2   :  { %4182 = vrsqrt.f32 %v176_v63  ;;  %vm183_vm2 = vweird.f32 %v176_v63 }
  0xa8   :  { %v4183_v22 = vpop.eup %4182 }
  0xa9   :  { %v178_v23 = vmul.f32 %v4183_v22, %v176_v63  ;;  %vm184_vm1 = vweird.f32 %v4183_v22 }
  0xaa   :  { %vm185_vm3 = vmor %vm183_vm2, %vm184_vm1 }
  0xab   :  { %v179_v24 = vmul.f32 %v4183_v22, %v178_v23 }
  0xad   :  { %v180_v25 = vmul.f32 0.5, %v179_v24 }
  0xaf   :  { %v181_v26 = vsub.f32 1.5, %v180_v25 }
  0xb1   :  { %v182_v28 = vmul.f32 %v4183_v22, %v181_v26  ;;  %v700_v26 = vld [vmem:[#allocation6] sm:$0xff] }
  0xb3   :  { %v186_v31 = vsel %vm185_vm3, %v4183_v22, %v182_v28 }
  0xb4   :  { %v187_v32 = vmul.f32 %v186_v31, %v4554_v0  ;;  %v188_v33 = vmul.f32 %v186_v31, %v4556_v1  ;;  %v262_v0 = vld [vmem:[%s4726_s5] sm:$0xf] }
  0xb5   :  { %v265_v41 = vperm.slane %v262_v0, 1  ;;  %v264_v43 = vperm.slane %v262_v0, 0  ;;  %v266_v50 = vperm.slane %v262_v0, 2  ;;  %v267_v58 = vperm.slane %v262_v0, 3 }
  0xb6   :  { %v194_v34 = vmul.f32 %v190_v29, %v187_v32  ;;  %v195_v35 = vmul.f32 %v191_v30, %v188_v33 }
  0xb8   :  { %v196_v36 = vpack.c.bf16 %v194_v34, %v194_v34  ;;  %v197_v37 = vpack.c.bf16 %v195_v35, %v195_v35 }
  0xba   :  { %600 = vmatmul.bf16.vlgmr.msra.gmra.mxu0 %v196_v36  ;;  %613 = vmatmul.bf16.vlgmr.msra.gmra.mxu1 %v197_v37 }
  0xbb   :  { %626 = vmatmul.bf16.vlgmr.msra.gmra.mxu2 %v196_v36  ;;  %639 = vmatmul.bf16.vlgmr.msra.gmra.mxu3 %v197_v37 }
  0xca   :  { %652 = vmatmul.bf16.vlgmr.msrb.gmra.mxu0 %v196_v36  ;;  %665 = vmatmul.bf16.vlgmr.msrb.gmra.mxu1 %v197_v37 }
  0xcb   :  { %678 = vmatmul.bf16.vlgmr.msrb.gmra.mxu2 %v196_v36  ;;  %691 = vmatmul.bf16.vlgmr.msrb.gmra.mxu3 %v197_v37 }
 0x137   :  { %v601_v38 = vpop.f32.mrf.mxu0  ;;  %v614_v40 = vpop.f32.mrf.mxu1 }
 0x138   :  { %v602_v48 = vadd.f32 %v601_v38, %v264_v43  ;;  %v3033_v43 = vld [vmem:[#allocation12 + $0x70] sm:$0xf] }
 0x13a   :  { %v615_v53 = vadd.f32 %v614_v40, %v602_v48  ;;  %v3953_v48 = vld [vmem:[#allocation12 + $0x74] sm:$0xf] }
 0x13c   :  { %v696_v57 = vmul.f32 0.088388346, %v615_v53  ;;  %v3099_v53 = vld [vmem:[#allocation12 + $0xf8] sm:$0xf0] }
 0x13e   :  { %v627_v1 = vpop.f32.mrf.mxu2  ;;  %v640_v42 = vpop.f32.mrf.mxu3  ;;  %v705_v19 = vmul.f32 %v698_v8, %v696_v57 }
 0x13f   :  { %v628_v44 = vadd.f32 %v627_v1, %v265_v41  ;;  %v603_v45 = vpop.f32.mrf.mxu0  ;;  %v616_v46 = vpop.f32.mrf.mxu1 }
 0x140   :  { %v3097_v45 = vld [vmem:[#allocation12 + $0xf0] sm:$0xf] }
 0x141   :  { %v641_v47 = vadd.f32 %v640_v42, %v628_v44  ;;  %v3954_v44 = vld [vmem:[#allocation12 + $0x74] sm:$0xf0] }
 0x142   :  { %v3034_v46 = vor.u32 %v3954_v44, %v3033_v43  ;;  %v3945_v43 = vld [vmem:[#allocation12 + $0x34] sm:$0xf]  ;;  %v3003_v44 = vld [vmem:[#allocation12 + $0x38] sm:$0xf0] }
 0x143   :  { %v697_v49 = vmul.f32 0.088388346, %v641_v47  ;;  %v3970_v47 = vld [vmem:[#allocation12 + $0xf4] sm:$0xf0] }
 0x145   :  { %767 = vrot.lane.b32.xlu1 %v697_v49, %s4457_s3  ;;  %v770_v20 = vmul.f32 %v698_v8, %v697_v49  ;;  %v3035_v49 = vld [vmem:[#allocation12 + $0x78] sm:$0xf0] }
 0x146   :  { %v629_v51 = vpop.f32.mrf.mxu2  ;;  %v642_v52 = vpop.f32.mrf.mxu3 }
 0x147   :  { %v653_v54 = vpop.f32.mrf.mxu0  ;;  %v666_v16 = vpop.f32.mrf.mxu1  ;;  %v3038_v51 = vor.u32 %v3953_v48, %v3035_v49  ;;  %v3969_v52 = vld [vmem:[#allocation12 + $0xf4] sm:$0xf]  ;;  %v2993_v49 = vld [vmem:[#allocation12 + $0x20] sm:$0xf] }
 0x148   :  { %v654_v55 = vadd.f32 %v653_v54, %v266_v50  ;;  %v3098_v50 = vor.u32 %v3970_v47, %v3097_v45  ;;  %v3025_v54 = vld [vmem:[#allocation12 + $0x60] sm:$0xf]  ;;  %v3067_v47 = vld [vmem:[#allocation12 + $0xb8] sm:$0xf0] }
 0x14a   :  { %v667_v56 = vadd.f32 %v666_v16, %v654_v55  ;;  %v3102_v16 = vor.u32 %v3969_v52, %v3099_v53  ;;  %v3952_v55 = vld [vmem:[#allocation12 + $0x64] sm:$0xf0]  ;;  %v3943_v53 = vld [vmem:[#allocation12 + $0x24] sm:$0xf] }
 0x14b   :  { %v3960_v52 = vld [vmem:[#allocation12 + $0xa4] sm:$0xf0] }
 0x14c   :  { %709 = vrot.lane.b32.xlu0 %v667_v56, %s4457_s3  ;;  %v712_v11 = vmul.f32 %v698_v8, %v667_v56  ;;  %v3089_v56 = vld [vmem:[#allocation12 + $0xe0] sm:$0xf]  ;;  %v3949_v8 = vld [vmem:[#allocation12 + $0x54] sm:$0xf] }
 0x14d   :  { %702 = vrot.lane.b32.xlu1 %v696_v57, %s4457_s3  ;;  %v3968_v57 = vld [vmem:[#allocation12 + $0xe4] sm:$0xf0] }
 0x14e   :  { %v679_v59 = vpop.f32.mrf.mxu2  ;;  %v692_v60 = vpop.f32.mrf.mxu3 }
 0x14f   :  { %v680_v61 = vadd.f32 %v679_v59, %v267_v58  ;;  %v655_v62 = vpop.f32.mrf.mxu0  ;;  %v668_v63 = vpop.f32.mrf.mxu1  ;;  %v3026_v58 = vor.u32 %v3952_v55, %v3025_v54  ;;  %v3090_v59 = vor.u32 %v3968_v57, %v3089_v56  ;;  %v2995_v54 = vld [vmem:[#allocation12 + $0x28] sm:$0xf0]  ;;  %v3959_v56 = vld [vmem:[#allocation12 + $0xa4] sm:$0xf] }
 0x150   :  { %v3967_v62 = vld [vmem:[#allocation12 + $0xe4] sm:$0xf]  ;;  %v2998_v55 = vor.u32 %v3943_v53, %v2995_v54  ;;  %v3059_v57 = vld [vmem:[#allocation12 + $0xa8] sm:$0xf0] }
 0x151   :  { %v693_v2 = vadd.f32 %v692_v60, %v680_v61  ;;  %v3951_v60 = vld [vmem:[#allocation12 + $0x64] sm:$0xf]  ;;  %v3027_v61 = vld [vmem:[#allocation12 + $0x68] sm:$0xf0] }
 0x152   :  { %v3030_v63 = vor.u32 %v3951_v60, %v3027_v61  ;;  %v3942_v60 = vld [vmem:[#allocation12 + $0x14] sm:$0xf0]  ;;  %v3049_v61 = vld [vmem:[#allocation12 + $0x90] sm:$0xf]  ;;  %v3555_v54 = vld [vmem:[#allocation14 + $0x3a0] sm:$0xf0] }
 0x153   :  { %v743_v3 = vpack.c.bf16 %v693_v2, %v693_v2  ;;  %v3091_v2 = vld [vmem:[#allocation12 + $0xe8] sm:$0xf0] }
 0x155   :  { %v749_v4 = vsel %vm747_vm4, %v743_v3, 0  ;;  %v3017_v3 = vld [vmem:[#allocation12 + $0x50] sm:$0xf] }
 0x156   :  { %v681_v5 = vpop.f32.mrf.mxu2  ;;  %v694_v6 = vpop.f32.mrf.mxu3  ;;  %758 = vmatpush.bf16.msra.mxu1 %v749_v4  ;;  %809 = vmatpush.bf16.msra.mxu3 %v749_v4  ;;  %v3950_v4 = vld [vmem:[#allocation12 + $0x54] sm:$0xf0] }
 0x157   :  { %v3094_v5 = vor.u32 %v3967_v62, %v3091_v2  ;;  %v3081_v6 = vld [vmem:[#allocation12 + $0xd0] sm:$0xf]  ;;  %v3941_v2 = vld [vmem:[#allocation12 + $0x14] sm:$0xf] }
 0x15a   :  { %1030 = vmatpush.bf16.msrb.mxu1 %v3098_v50  ;;  %1056 = vmatpush.bf16.msrb.mxu3 %v3102_v16  ;;  %v3057_v50 = vld [vmem:[#allocation12 + $0xa0] sm:$0xf] }
 0x15b   :  { %v3058_v16 = vor.u32 %v3960_v52, %v3057_v50  ;;  %v4019_v50 = vld [vmem:[#allocation14 + $0x184] sm:$0xf] }
 0x15c   :  { %v4083_v52 = vld [vmem:[#allocation14 + $0x384] sm:$0xf] }
 0x15e   :  { %1031 = vmatpush.bf16.msrb.mxu1 %v3090_v59  ;;  %1057 = vmatpush.bf16.msrb.mxu3 %v3094_v5  ;;  %v2985_v59 = vld [vmem:[#allocation12 + $0x10] sm:$0xf] }
 0x15f   :  { %v2986_v62 = vor.u32 %v3942_v60, %v2985_v59  ;;  %v4011_v59 = vld [vmem:[#allocation14 + $0x144] sm:$0xf] }
 0x1b7   :  { %v768_v7 = vpop.permute.xlu1 %767 }
 0x1b8   :  { %v771_v15 = vmul.f32 %v768_v7, %v699_v9  ;;  %v3966_v7 = vld [vmem:[#allocation12 + $0xd4] sm:$0xf0] }
 0x1ba   :  { %v772_v21 = vadd.f32 %v771_v15, %v770_v20  ;;  %v3009_v15 = vld [vmem:[#allocation12 + $0x40] sm:$0xf]  ;;  %v3964_v20 = vld [vmem:[#allocation12 + $0xc4] sm:$0xf0] }
 0x1bc   :  { %v773_v23 = vpack.c.bf16 %v772_v21, %v772_v21  ;;  %v3947_v21 = vld [vmem:[#allocation12 + $0x44] sm:$0xf] }
 0x1be   :  { %v710_v10 = vpop.permute.xlu0 %709 }
 0x1bf   :  { %v713_v12 = vmul.f32 %v710_v10, %v699_v9  ;;  %v703_v13 = vpop.permute.xlu1 %702  ;;  %v3019_v10 = vld [vmem:[#allocation12 + $0x58] sm:$0xf0] }
 0x1c0   :  { %v706_v17 = vmul.f32 %v703_v13, %v699_v9  ;;  %v3018_v9 = vor.u32 %v3950_v4, %v3017_v3  ;;  %v3082_v13 = vor.u32 %v3966_v7, %v3081_v6  ;;  %v2987_v3 = vld [vmem:[#allocation12 + $0x18] sm:$0xf0]  ;;  %v3957_v6 = vld [vmem:[#allocation12 + $0x94] sm:$0xf] }
 0x1c1   :  { %v714_v14 = vadd.f32 %v713_v12, %v712_v11  ;;  %v3965_v11 = vld [vmem:[#allocation12 + $0xd4] sm:$0xf]  ;;  %v3083_v12 = vld [vmem:[#allocation12 + $0xd8] sm:$0xf0]  ;;  %v2990_v5 = vor.u32 %v3941_v2, %v2987_v3 }
 0x1c2   :  { %v707_v22 = vadd.f32 %v706_v17, %v705_v19  ;;  %v3948_v17 = vld [vmem:[#allocation12 + $0x44] sm:$0xf0]  ;;  %v3086_v19 = vor.u32 %v3965_v11, %v3083_v12  ;;  %1032 = vmatpush.bf16.msrb.mxu1 %v3082_v13  ;;  %v3051_v7 = vld [vmem:[#allocation12 + $0x98] sm:$0xf0]  ;;  %v3041_v11 = vld [vmem:[#allocation12 + $0x80] sm:$0xf] }
 0x1c3   :  { %v716_v18 = vpack.c.bf16 %v714_v14, %v714_v14  ;;  %v3022_v14 = vor.u32 %v3949_v8, %v3019_v10  ;;  %v2977_v8 = vld [vmem:[#allocation12] sm:$0xf]  ;;  %v3940_v10 = vld [vmem:[#allocation12 + $0x4] sm:$0xf0] }
 0x1c4   :  { %v715_v24 = vpack.c.bf16 %v707_v22, %v707_v22  ;;  %v3011_v22 = vld [vmem:[#allocation12 + $0x48] sm:$0xf0]  ;;  %1058 = vmatpush.bf16.msrb.mxu3 %v3086_v19  ;;  %v3956_v12 = vld [vmem:[#allocation12 + $0x84] sm:$0xf0]  ;;  %v2978_v13 = vor.u32 %v3940_v10, %v2977_v8  ;;  %v4071_v8 = vld [vmem:[#allocation14 + $0x31c] sm:$0xf0] }
 0x1c5   :  { %724 = vmatpush.bf16.xpose.msra.mxu0 %v716_v18  ;;  %781 = vmatpush.bf16.xpose.msra.mxu2 %v716_v18  ;;  %v3073_v18 = vld [vmem:[#allocation12 + $0xc0] sm:$0xf]  ;;  %v3235_v10 = vld [vmem:[#allocation14 + $0x120] sm:$0xf0] }
 0x1cc   :  { %725 = vmatmul.bf16.vlgmr.msra.gmra.mxu0 %v715_v24  ;;  %782 = vmatmul.bf16.vlgmr.msra.gmra.mxu2 %v773_v23  ;;  %v3963_v23 = vld [vmem:[#allocation12 + $0xc4] sm:$0xf]  ;;  %v3075_v24 = vld [vmem:[#allocation12 + $0xc8] sm:$0xf0] }
 0x1cd   :  { %1017 = vmatpush.bf16.msrb.mxu0 %v3034_v46  ;;  %1043 = vmatpush.bf16.msrb.mxu2 %v3038_v51  ;;  %v3961_v46 = vld [vmem:[#allocation12 + $0xb4] sm:$0xf] }
 0x1ce   :  { %v3070_v48 = vor.u32 %v3961_v46, %v3067_v47  ;;  %v4023_v46 = vld [vmem:[#allocation14 + $0x19c] sm:$0xf0] }
 0x1cf   :  { %v3553_v47 = vld [vmem:[#allocation14 + $0x380] sm:$0xf] }
 0x1d1   :  { %1018 = vmatpush.bf16.msrb.mxu0 %v3026_v58  ;;  %1044 = vmatpush.bf16.msrb.mxu2 %v3030_v63  ;;  %v3062_v58 = vor.u32 %v3959_v56, %v3059_v57  ;;  %v3958_v63 = vld [vmem:[#allocation12 + $0x94] sm:$0xf0]  ;;  %v3558_v56 = vor.u32 %v4083_v52, %v3555_v54  ;;  %v3521_v57 = vld [vmem:[#allocation14 + $0x340] sm:$0xf] }
 0x1d2   :  { %v3050_v4 = vor.u32 %v3958_v63, %v3049_v61  ;;  %v3267_v61 = vld [vmem:[#allocation14 + $0x160] sm:$0xf0] }
 0x1d3   :  { %v3523_v63 = vld [vmem:[#allocation14 + $0x360] sm:$0xf0]  ;;  %v3270_v3 = vor.u32 %v4011_v59, %v3267_v61 }
 0x1d5   :  { %1019 = vmatpush.bf16.msrb.mxu0 %v3018_v9  ;;  %1045 = vmatpush.bf16.msrb.mxu2 %v3022_v14  ;;  %v3054_v9 = vor.u32 %v3957_v6, %v3051_v7  ;;  %v3042_v14 = vor.u32 %v3956_v12, %v3041_v11  ;;  %v3489_v6 = vld [vmem:[#allocation14 + $0x300] sm:$0xf]  ;;  %v4067_v11 = vld [vmem:[#allocation14 + $0x304] sm:$0xf] }
 0x1d6   :  { %v3491_v12 = vld [vmem:[#allocation14 + $0x320] sm:$0xf0] }
 0x249   :  { %v726_v25 = vpop.f32.mrf.mxu0 }
 0x24a   :  { %v727_v31 = vadd.f32 %v726_v25, %v700_v26  ;;  %v3010_v25 = vor.u32 %v3948_v17, %v3009_v15  ;;  %v3939_v15 = vld [vmem:[#allocation12 + $0x4] sm:$0xf]  ;;  %v2979_v17 = vld [vmem:[#allocation12 + $0x8] sm:$0xf0] }
 0x24b   :  { %v2982_v19 = vor.u32 %v3939_v15, %v2979_v17  ;;  %v3201_v17 = vld [vmem:[#allocation14 + $0xc0] sm:$0xf] }
 0x24c   :  { %v731_v33 = vsel %vm730_vm5, %v727_v31, -inf  ;;  %1020 = vmatpush.bf16.msrb.mxu0 %v3010_v25 }
 0x24f   :  { %v783_v27 = vpop.f32.mrf.mxu2 }
 0x250   :  { %v784_v28 = vadd.f32 %v783_v27, %v700_v26  ;;  %v3074_v27 = vor.u32 %v3964_v20, %v3073_v18  ;;  %v3955_v18 = vld [vmem:[#allocation12 + $0x84] sm:$0xf]  ;;  %v3043_v20 = vld [vmem:[#allocation12 + $0x88] sm:$0xf0] }
 0x251   :  { %v728_v29 = vpop.f32.mrf.mxu0 }
 0x252   :  { %v787_v30 = vsel %vm730_vm5, %v784_v28, -inf  ;;  %v3078_v29 = vor.u32 %v3963_v23, %v3075_v24  ;;  %1033 = vmatpush.bf16.msrb.mxu1 %v3074_v27 }
 0x253   :  { %788 = vmax.xlane.f32.xlu2 %v787_v30 }
 0x254   :  { %1059 = vmatpush.bf16.msrb.mxu3 %v3078_v29 }
 0x257   :  { %v785_v32 = vpop.f32.mrf.mxu2 }
 0x258   :  { %1060 = vmatpush.bf16.msrb.mxu3 %v3070_v48  ;;  %v4087_v48 = vld [vmem:[#allocation14 + $0x39c] sm:$0xf0] }
 0x25b   :  { %732 = vmax.xlane.f32.xlu2 %v731_v33 }
 0x25c   :  { %1061 = vmatpush.bf16.msrb.mxu3 %v3062_v58  ;;  %v4079_v58 = vld [vmem:[#allocation14 + $0x35c] sm:$0xf0] }
 0x25d   :  { %v3522_v2 = vor.u32 %v4079_v58, %v3521_v57 }
 0x260   :  { %1062 = vmatpush.bf16.msrb.mxu3 %v3054_v9  ;;  %v4003_v9 = vld [vmem:[#allocation14 + $0x104] sm:$0xf] }
 0x261   :  { %v3238_v15 = vor.u32 %v4003_v9, %v3235_v10  ;;  %v3363_v9 = vld [vmem:[#allocation14 + $0x220] sm:$0xf0]  ;;  %v3337_v10 = vld [vmem:[#allocation14 + $0x1c8] sm:$0xf] }
 0x2c6   :  { %v789_v34 = vpop.xlane.xlu2 %788 }
 0x2c7   :  { %v790_v35 = vsub.f32 %v784_v28, %v789_v34  ;;  %v3014_v28 = vor.u32 %v3947_v21, %v3011_v22  ;;  %v3046_v21 = vor.u32 %v3955_v18, %v3043_v20  ;;  %v3999_v18 = vld [vmem:[#allocation14 + $0xdc] sm:$0xf0]  ;;  %v3494_v20 = vor.u32 %v4067_v11, %v3491_v12  ;;  %v4032_v11 = vld [vmem:[#allocation14 + $0x1e4] sm:$0xf0] }
 0x2c9   :  { %v791_v36 = vmul.f32 1.442695, %v790_v35  ;;  %1046 = vmatpush.bf16.msrb.mxu2 %v3014_v28  ;;  %1063 = vmatpush.bf16.msrb.mxu3 %v3046_v21  ;;  %v4063_v21 = vld [vmem:[#allocation14 + $0x2dc] sm:$0xf0] }
 0x2cb   :  { %4184 = vpow2.f32 %v791_v36 }
 0x2ce   :  { %v733_v37 = vpop.xlane.xlu2 %732 }
 0x2cf   :  { %v734_v38 = vsub.f32 %v727_v31, %v733_v37  ;;  %v3001_v37 = vld [vmem:[#allocation12 + $0x30] sm:$0xf] }
 0x2d1   :  { %v4585_v40 = vpop.eup %4184  ;;  %v735_v0 = vmul.f32 1.442695, %v734_v38  ;;  %v3946_v38 = vld [vmem:[#allocation12 + $0x34] sm:$0xf0] }
 0x2d2   :  { %v793_v41 = vsel %vm730_vm5, %v4585_v40, 0.0 }
 0x2d3   :  { %4186 = vpow2.f32 %v735_v0  ;;  %794 = vadd.xlane.f32.xlu1 %v793_v41  ;;  %v3065_v0 = vld [vmem:[#allocation12 + $0xb0] sm:$0xf]  ;;  %v3002_v41 = vor.u32 %v3946_v38, %v3001_v37  ;;  %v4095_v37 = vld [vmem:[#allocation14 + $0x3dc] sm:$0xf0]  ;;  %v4027_v38 = vld [vmem:[#allocation14 + $0x1c4] sm:$0xf] }
 0x2d5   :  { %1021 = vmatpush.bf16.msrb.mxu0 %v3002_v41 }
 0x2d9   :  { %v4589_v1 = vpop.eup %4186 }
 0x2da   :  { %v737_v42 = vsel %vm730_vm5, %v4589_v1, 0.0 }
 0x2db   :  { %738 = vadd.xlane.f32.xlu2 %v737_v42  ;;  %v3962_v42 = vld [vmem:[#allocation12 + $0xb4] sm:$0xf0] }
 0x2dc   :  { %v3066_v45 = vor.u32 %v3962_v42, %v3065_v0  ;;  %v3331_v0 = vld [vmem:[#allocation14 + $0x1e0] sm:$0xf0] }
 0x2dd   :  { %v3334_v42 = vor.u32 %v4027_v38, %v3331_v0  ;;  %v4051_v38 = vld [vmem:[#allocation14 + $0x284] sm:$0xf] }
 0x2de   :  { %1034 = vmatpush.bf16.msrb.mxu1 %v3066_v45  ;;  %v3297_v45 = vld [vmem:[#allocation14 + $0x180] sm:$0xf]  ;;  %v3427_v0 = vld [vmem:[#allocation14 + $0x2a0] sm:$0xf0] }
 0x2e2   :  { %1035 = vmatpush.bf16.msrb.mxu1 %v3058_v16  ;;  %v3265_v16 = vld [vmem:[#allocation14 + $0x140] sm:$0xf] }
 0x2e6   :  { %1036 = vmatpush.bf16.msrb.mxu1 %v3050_v4  ;;  %v3233_v4 = vld [vmem:[#allocation14 + $0x100] sm:$0xf] }
 0x2ea   :  { %1037 = vmatpush.bf16.msrb.mxu1 %v3042_v14  ;;  %v3490_v14 = vor.u32 %v4071_v8, %v3489_v6  ;;  %v4035_v6 = vld [vmem:[#allocation14 + $0x204] sm:$0xf] }
 0x346   :  { %v795_v26 = vpop.xlane.xlu1 %794 }
 0x347   :  { %4188 = vrcp.f32 %v795_v26 }
 0x34d   :  { %v4189_v30 = vpop.eup %4188 }
 0x34e   :  { %v797_v31 = vmul.f32 %v4189_v30, %v4585_v40  ;;  %v739_v32 = vpop.xlane.xlu2 %738  ;;  %v3006_v40 = vor.u32 %v3945_v43, %v3003_v44  ;;  %v4091_v43 = vld [vmem:[#allocation14 + $0x3c4] sm:$0xf] }
 0x34f   :  { %4190 = vrcp.f32 %v739_v32  ;;  %v3587_v44 = vld [vmem:[#allocation14 + $0x3e0] sm:$0xf0] }
 0x350   :  { %v798_v33 = vpack.c.bf16 %v797_v31, %v797_v31  ;;  %1047 = vmatpush.bf16.msrb.mxu2 %v3006_v40  ;;  %v3590_v40 = vor.u32 %v4091_v43, %v3587_v44 }
 0x352   :  { %2974 = vmatmul.msk.bf16.vlgmr.msra.gmra.mxu3 %vm730_vm5, %v798_v33  ;;  %v3329_v33 = vld [vmem:[#allocation14 + $0x1c0] sm:$0xf] }
 0x353   :  { %1907 = vmatpush.bf16.msra.mxu3 %v3590_v40  ;;  %v3983_v40 = vld [vmem:[#allocation14 + $0x5c] sm:$0xf0] }
 0x354   :  { %1048 = vmatpush.bf16.msrb.mxu2 %v2998_v55  ;;  %v4015_v55 = vld [vmem:[#allocation14 + $0x15c] sm:$0xf0] }
 0x355   :  { %v4191_v34 = vpop.eup %4190  ;;  %v3266_v60 = vor.u32 %v4015_v55, %v3265_v16  ;;  %v3105_v55 = vld [vmem:[#allocation14] sm:$0xf] }
 0x356   :  { %v741_v35 = vmul.f32 %v4191_v34, %v4589_v1  ;;  %v3944_v1 = vld [vmem:[#allocation12 + $0x24] sm:$0xf0]  ;;  %v4031_v34 = vld [vmem:[#allocation14 + $0x1dc] sm:$0xf0] }
 0x357   :  { %v2994_v51 = vor.u32 %v3944_v1, %v2993_v49  ;;  %v3298_v49 = vor.u32 %v4023_v46, %v3297_v45  ;;  %v3554_v1 = vor.u32 %v4087_v48, %v3553_v47  ;;  %1908 = vmatpush.bf16.msra.mxu3 %v3558_v56  ;;  %v3393_v46 = vld [vmem:[#allocation14 + $0x240] sm:$0xf]  ;;  %v3430_v48 = vor.u32 %v4051_v38, %v3427_v0  ;;  %v4212_v56 = vld [vmem:[#allocation3] sm:$0xff]  ;;  %v3307_v38 = vld [vmem:[#allocation14 + $0x1a8] sm:$0xf0] }
 0x358   :  { %v742_v36 = vpack.c.bf16 %v741_v35, %v741_v35  ;;  %1049 = vmatpush.bf16.msrb.mxu2 %v2990_v5  ;;  %v3585_v35 = vld [vmem:[#allocation14 + $0x3c0] sm:$0xf] }
 0x359   :  { %1022 = vmatpush.bf16.msrb.mxu0 %v2994_v51  ;;  %v3586_v41 = vor.u32 %v4095_v37, %v3585_v35  ;;  %v3299_v51 = vld [vmem:[#allocation14 + $0x1a0] sm:$0xf0]  ;;  %v4007_v5 = vld [vmem:[#allocation14 + $0x11c] sm:$0xf0] }
 0x35a   :  { %2973 = vmatmul.msk.bf16.vlgmr.msra.gmra.mxu1 %vm730_vm5, %v742_v36  ;;  %v3330_v36 = vor.u32 %v4031_v34, %v3329_v33  ;;  %v3302_v53 = vor.u32 %v4019_v50, %v3299_v51  ;;  %v3425_v33 = vld [vmem:[#allocation14 + $0x280] sm:$0xf]  ;;  %v3171_v37 = vld [vmem:[#allocation14 + $0xa0] sm:$0xf0] }
 0x35b   :  { %1881 = vmatpush.bf16.msra.mxu1 %v3586_v41  ;;  %v4055_v35 = vld [vmem:[#allocation14 + $0x29c] sm:$0xf0]  ;;  %v4043_v50 = vld [vmem:[#allocation14 + $0x244] sm:$0xf] }
 0x35c   :  { %1050 = vmatpush.bf16.msrb.mxu2 %v2982_v19  ;;  %v3457_v19 = vld [vmem:[#allocation14 + $0x2c0] sm:$0xf]  ;;  %v3426_v44 = vor.u32 %v4055_v35, %v3425_v33  ;;  %v3395_v51 = vld [vmem:[#allocation14 + $0x260] sm:$0xf0]  ;;  %v4024_v33 = vld [vmem:[#allocation14 + $0x1a4] sm:$0xf0] }
 0x35d   :  { %1023 = vmatpush.bf16.msrb.mxu0 %v2986_v62  ;;  %v4075_v62 = vld [vmem:[#allocation14 + $0x344] sm:$0xf]  ;;  %v4047_v47 = vld [vmem:[#allocation14 + $0x25c] sm:$0xf0] }
 0x35e   :  { %v3526_v7 = vor.u32 %v4075_v62, %v3523_v63  ;;  %v3394_v16 = vor.u32 %v4047_v47, %v3393_v46  ;;  %v3975_v62 = vld [vmem:[#allocation14 + $0x1c] sm:$0xf0]  ;;  %v3529_v46 = vld [vmem:[#allocation14 + $0x348] sm:$0xf] }
 0x35f   :  { %1882 = vmatpush.bf16.msra.mxu1 %v3554_v1  ;;  %v3139_v1 = vld [vmem:[#allocation14 + $0x60] sm:$0xf0]  ;;  %v3361_v63 = vld [vmem:[#allocation14 + $0x200] sm:$0xf]  ;;  %v3106_v12 = vor.u32 %v3975_v62, %v3105_v55  ;;  %v4008_v55 = vld [vmem:[#allocation14 + $0x124] sm:$0xf0] }
 0x360   :  { %1894 = vmatpush.bf16.msra.mxu2 %v3334_v42  ;;  %1909 = vmatpush.bf16.msra.mxu3 %v3526_v7  ;;  %v3137_v42 = vld [vmem:[#allocation14 + $0x40] sm:$0xf] }
 0x361   :  { %1024 = vmatpush.bf16.msrb.mxu0 %v2978_v13  ;;  %v3234_v13 = vor.u32 %v4007_v5, %v3233_v4  ;;  %v3138_v54 = vor.u32 %v3983_v40, %v3137_v42  ;;  %v3971_v4 = vld [vmem:[#allocation14 + $0x4] sm:$0xf]  ;;  %v4084_v42 = vld [vmem:[#allocation14 + $0x38c] sm:$0xf]  ;;  %v4016_v40 = vld [vmem:[#allocation14 + $0x164] sm:$0xf0] }
 0x362   :  { %v3107_v5 = vld [vmem:[#allocation14 + $0x20] sm:$0xf0] }
 0x363   :  { %1883 = vmatpush.bf16.msra.mxu1 %v3522_v2  ;;  %v4039_v2 = vld [vmem:[#allocation14 + $0x21c] sm:$0xf0] }
 0x364   :  { %1895 = vmatpush.bf16.msra.mxu2 %v3302_v53  ;;  %1910 = vmatpush.bf16.msra.mxu3 %v3494_v20  ;;  %v4213_v7 = vld [vmem:[#allocation3 + $0x8] sm:$0xff]  ;;  %v3339_v20 = vld [vmem:[#allocation14 + $0x1e8] sm:$0xf0] }
 0x365   :  { %1868 = vmatpush.bf16.msra.mxu0 %v3330_v36  ;;  %v3987_v36 = vld [vmem:[#allocation14 + $0x84] sm:$0xf] }
 0x366   :  { %v3174_v45 = vor.u32 %v3987_v36, %v3171_v37  ;;  %v4088_v36 = vld [vmem:[#allocation14 + $0x3a4] sm:$0xf0]  ;;  %v4020_v37 = vld [vmem:[#allocation14 + $0x18c] sm:$0xf] }
 0x367   :  { %1884 = vmatpush.bf16.msra.mxu1 %v3490_v14  ;;  %v4096_v14 = vld [vmem:[#allocation14 + $0x3e4] sm:$0xf0] }
 0x368   :  { %1896 = vmatpush.bf16.msra.mxu2 %v3270_v3  ;;  %v3398_v3 = vor.u32 %v4043_v50, %v3395_v51 }
 0x369   :  { %1869 = vmatpush.bf16.msra.mxu0 %v3298_v49  ;;  %v3979_v49 = vld [vmem:[#allocation14 + $0x44] sm:$0xf] }
 0x36a   :  { %v3142_v61 = vor.u32 %v3979_v49, %v3139_v1  ;;  %v4012_v49 = vld [vmem:[#allocation14 + $0x14c] sm:$0xf] }
 0x36b   :  { %v3275_v1 = vld [vmem:[#allocation14 + $0x168] sm:$0xf0] }
 0x36c   :  { %1897 = vmatpush.bf16.msra.mxu2 %v3238_v15  ;;  %v4028_v15 = vld [vmem:[#allocation14 + $0x1cc] sm:$0xf]  ;;  %v3278_v51 = vor.u32 %v4012_v49, %v3275_v1 }
 0x36d   :  { %1870 = vmatpush.bf16.msra.mxu0 %v3266_v60  ;;  %v3115_v49 = vld [vmem:[#allocation14 + $0x28] sm:$0xf0] }
 0x371   :  { %1871 = vmatpush.bf16.msra.mxu0 %v3234_v13  ;;  %v3593_v13 = vld [vmem:[#allocation14 + $0x3c8] sm:$0xf] }
 0x3d5   :  { %v811_v22 = vpop.f32.mrf.mxu3 }
 0x3d6   :  { %v815_v23 = vpack.c.bf16 %v811_v22, %v811_v22  ;;  %v3995_v22 = vld [vmem:[#allocation14 + $0xc4] sm:$0xf] }
 0x3d7   :  { %v760_v24 = vpop.f32.mrf.mxu1 }
 0x3d8   :  { %816 = vst [vmem:[#allocation2 + $0x4] sm:$0xf] %v815_v23  ;;  %v764_v25 = vpack.c.bf16 %v760_v24, %v760_v24  ;;  %v3203_v23 = vld [vmem:[#allocation14 + $0xe0] sm:$0xf0] }
 0x3d9   :  { %v4059_v24 = vld [vmem:[#allocation14 + $0x2c4] sm:$0xf] }
 0x3da   :  { %765 = vst [vmem:[#allocation2] sm:$0xf] %v764_v25  ;;  %v3459_v25 = vld [vmem:[#allocation14 + $0x2e0] sm:$0xf0] }
 0x3db   :  { %v3462_v34 = vor.u32 %v4059_v24, %v3459_v25  ;;  %v3366_v24 = vor.u32 %v4035_v6, %v3363_v9  ;;  %v4000_v6 = vld [vmem:[#allocation14 + $0xe4] sm:$0xf0] }
 0x3dd   :  { %v813_v26 = vpop.f32.mrf.mxu3  ;;  %1911 = vmatpush.bf16.msra.mxu3 %v3462_v34  ;;  %v3561_v34 = vld [vmem:[#allocation14 + $0x388] sm:$0xf] }
 0x3de   :  { %v3202_v26 = vor.u32 %v3999_v18, %v3201_v17  ;;  %v3562_v0 = vor.u32 %v4088_v36, %v3561_v34  ;;  %v3980_v36 = vld [vmem:[#allocation14 + $0x4c] sm:$0xf] }
 0x3df   :  { %v762_v27 = vpop.f32.mrf.mxu1 }
 0x3e0   :  { %1872 = vmatpush.bf16.msra.mxu0 %v3202_v26  ;;  %v3338_v26 = vor.u32 %v4032_v11, %v3337_v10  ;;  %v4064_v10 = vld [vmem:[#allocation14 + $0x2e4] sm:$0xf0]  ;;  %v3996_v11 = vld [vmem:[#allocation14 + $0xcc] sm:$0xf] }
 0x3e1   :  { %v817_v28 = vld [vmem:[#allocation2] sm:$0xff]  ;;  %1912 = vmatpush.bf16.msra.mxu3 %v3430_v48  ;;  %v4080_v48 = vld [vmem:[#allocation14 + $0x364] sm:$0xf0] }
 0x3e2   :  { %v851_v29 = vunpack.c.l.b16 %v817_v28  ;;  %v852_v30 = vunpack.c.h.b16 %v817_v28  ;;  %v3530_v50 = vor.u32 %v4080_v48, %v3529_v46  ;;  %v3972_v48 = vld [vmem:[#allocation14 + $0xc] sm:$0xf] }
 0x3e4   :  { %v853_v31 = vpack.c.b16 %v851_v29, %v851_v29  ;;  %v854_v32 = vpack.c.b16 %v852_v30, %v852_v30  ;;  %v3458_v29 = vor.u32 %v4063_v21, %v3457_v19  ;;  %v3206_v30 = vor.u32 %v3995_v22, %v3203_v23  ;;  %v4092_v21 = vld [vmem:[#allocation14 + $0x3cc] sm:$0xf] }
 0x3e5   :  { %v3362_v19 = vor.u32 %v4039_v2, %v3361_v63  ;;  %v3595_v22 = vld [vmem:[#allocation14 + $0x3e8] sm:$0xf0]  ;;  %1913 = vmatpush.bf16.msra.mxu3 %v3398_v3  ;;  %v3110_v23 = vor.u32 %v3971_v4, %v3107_v5  ;;  %v3209_v5 = vld [vmem:[#allocation14 + $0xc8] sm:$0xf] }
 0x3e6   :  { %1025 = vmatmul.bf16.vlgmr.msrb.gmra.mxu0 %v853_v31  ;;  %1038 = vmatmul.bf16.vlgmr.msrb.gmra.mxu1 %v854_v32  ;;  %v4068_v2 = vld [vmem:[#allocation14 + $0x30c] sm:$0xf]  ;;  %v3210_v9 = vor.u32 %v4000_v6, %v3209_v5 }
 0x3e7   :  { %1051 = vmatmul.bf16.vlgmr.msrb.gmra.mxu2 %v853_v31  ;;  %1064 = vmatmul.bf16.vlgmr.msrb.gmra.mxu3 %v854_v32  ;;  %v3169_v31 = vld [vmem:[#allocation14 + $0x80] sm:$0xf]  ;;  %v3499_v3 = vld [vmem:[#allocation14 + $0x328] sm:$0xf0] }
 0x3e8   :  { %v3991_v32 = vld [vmem:[#allocation14 + $0x9c] sm:$0xf0]  ;;  %1885 = vmatpush.bf16.msra.mxu1 %v3458_v29  ;;  %1898 = vmatpush.bf16.msra.mxu2 %v3206_v30  ;;  %v3342_v30 = vor.u32 %v4028_v15, %v3339_v20  ;;  %v3502_v4 = vor.u32 %v4068_v2, %v3499_v3  ;;  %v4060_v15 = vld [vmem:[#allocation14 + $0x2cc] sm:$0xf]  ;;  %v3992_v20 = vld [vmem:[#allocation14 + $0xa4] sm:$0xf0] }
 0x3e9   :  { %v3170_v41 = vor.u32 %v3991_v32, %v3169_v31  ;;  %v3598_v31 = vor.u32 %v4092_v21, %v3595_v22  ;;  %1914 = vmatpush.bf16.msra.mxu3 %v3366_v24  ;;  %v3305_v32 = vld [vmem:[#allocation14 + $0x188] sm:$0xf]  ;;  %v3988_v24 = vld [vmem:[#allocation14 + $0x8c] sm:$0xf] }
 0x3ea   :  { %v3306_v35 = vor.u32 %v4024_v33, %v3305_v32  ;;  %v3433_v21 = vld [vmem:[#allocation14 + $0x288] sm:$0xf] }
 0x3eb   :  { %1873 = vmatpush.bf16.msra.mxu0 %v3170_v41  ;;  %v3310_v41 = vor.u32 %v4020_v37, %v3307_v38  ;;  %v3984_v32 = vld [vmem:[#allocation14 + $0x64] sm:$0xf0]  ;;  %v3147_v37 = vld [vmem:[#allocation14 + $0x68] sm:$0xf0] }
 0x3ec   :  { %1886 = vmatpush.bf16.msra.mxu1 %v3426_v44  ;;  %1899 = vmatpush.bf16.msra.mxu2 %v3174_v45  ;;  %v3273_v45 = vld [vmem:[#allocation14 + $0x148] sm:$0xf] }
 0x3ed   :  { %1959 = vmatpush.bf16.msrb.mxu3 %v3598_v31  ;;  %v3274_v47 = vor.u32 %v4016_v40, %v3273_v45  ;;  %v3145_v31 = vld [vmem:[#allocation14 + $0x48] sm:$0xf] }
 0x3ee   :  { %v3401_v33 = vld [vmem:[#allocation14 + $0x248] sm:$0xf]  ;;  %v3146_v34 = vor.u32 %v3984_v32, %v3145_v31  ;;  %v4085_v31 = vld [vmem:[#allocation14 + $0x394] sm:$0xf] }
 0x3ef   :  { %1874 = vmatpush.bf16.msra.mxu0 %v3138_v54  ;;  %v3976_v45 = vld [vmem:[#allocation14 + $0x24] sm:$0xf0]  ;;  %v3571_v32 = vld [vmem:[#allocation14 + $0x3b0] sm:$0xf0] }
 0x3f0   :  { %1887 = vmatpush.bf16.msra.mxu1 %v3394_v16  ;;  %1900 = vmatpush.bf16.msra.mxu2 %v3142_v61  ;;  %v3241_v16 = vld [vmem:[#allocation14 + $0x108] sm:$0xf]  ;;  %v3243_v61 = vld [vmem:[#allocation14 + $0x128] sm:$0xf0] }
 0x3f1   :  { %v3369_v40 = vld [vmem:[#allocation14 + $0x208] sm:$0xf] }
 0x3f3   :  { %1875 = vmatpush.bf16.msra.mxu0 %v3106_v12  ;;  %v3211_v12 = vld [vmem:[#allocation14 + $0xe8] sm:$0xf0] }
 0x3f4   :  { %1888 = vmatpush.bf16.msra.mxu1 %v3362_v19  ;;  %1901 = vmatpush.bf16.msra.mxu2 %v3110_v23  ;;  %v3177_v19 = vld [vmem:[#allocation14 + $0x88] sm:$0xf] }
 0x3f5   :  { %v3178_v22 = vor.u32 %v3992_v20, %v3177_v19  ;;  %v4056_v23 = vld [vmem:[#allocation14 + $0x2a4] sm:$0xf0] }
 0x3f7   :  { %1920 = vmatpush.bf16.msrb.mxu0 %v3338_v26  ;;  %v3434_v26 = vor.u32 %v4056_v23, %v3433_v21  ;;  %v3313_v23 = vld [vmem:[#allocation14 + $0x190] sm:$0xf] }
 0x3f8   :  { %1946 = vmatpush.bf16.msrb.mxu2 %v3342_v30 }
 0x3fb   :  { %1921 = vmatpush.bf16.msrb.mxu0 %v3306_v35  ;;  %v4048_v35 = vld [vmem:[#allocation14 + $0x264] sm:$0xf0] }
 0x3fc   :  { %1947 = vmatpush.bf16.msrb.mxu2 %v3310_v41  ;;  %v3402_v38 = vor.u32 %v4048_v35, %v3401_v33  ;;  %v4044_v41 = vld [vmem:[#allocation14 + $0x24c] sm:$0xf]  ;;  %v3281_v35 = vld [vmem:[#allocation14 + $0x150] sm:$0xf] }
 0x3ff   :  { %1922 = vmatpush.bf16.msrb.mxu0 %v3274_v47  ;;  %v4040_v47 = vld [vmem:[#allocation14 + $0x224] sm:$0xf0] }
 0x400   :  { %1948 = vmatpush.bf16.msrb.mxu2 %v3278_v51  ;;  %v3370_v1 = vor.u32 %v4040_v47, %v3369_v40  ;;  %v4036_v51 = vld [vmem:[#allocation14 + $0x20c] sm:$0xf]  ;;  %v3249_v47 = vld [vmem:[#allocation14 + $0x110] sm:$0xf] }
 0x463   :  { %v1026_v27 = vpop.f32.mrf.mxu0  ;;  %v1039_v28 = vpop.f32.mrf.mxu1 }
 0x464   :  { %v1040_v43 = vadd.f32 %v1039_v28, %v1026_v27  ;;  %v3594_v27 = vor.u32 %v4096_v14, %v3593_v13  ;;  %v3214_v14 = vor.u32 %v3996_v11, %v3211_v12  ;;  %v4097_v11 = vld [vmem:[#allocation14 + $0x3ec] sm:$0xf0]  ;;  %v4029_v12 = vld [vmem:[#allocation14 + $0x1d4] sm:$0xf] }
 0x466   :  { %v4597_v57 = vadd.f32 %v4212_v56, %v1040_v43  ;;  %1933 = vmatpush.bf16.msrb.mxu1 %v3594_v27  ;;  %v3563_v43 = vld [vmem:[#allocation14 + $0x3a8] sm:$0xf0]  ;;  %v3497_v56 = vld [vmem:[#allocation14 + $0x308] sm:$0xf] }
 0x467   :  { %v3566_v44 = vor.u32 %v4084_v42, %v3563_v43  ;;  %v3403_v42 = vld [vmem:[#allocation14 + $0x268] sm:$0xf0] }
 0x468   :  { %v1072_v17 = vmul.f32 %v4597_v57, %v4597_v57  ;;  %v3406_v43 = vor.u32 %v4044_v41, %v3403_v42  ;;  %v4081_v41 = vld [vmem:[#allocation14 + $0x36c] sm:$0xf0]  ;;  %v4013_v42 = vld [vmem:[#allocation14 + $0x154] sm:$0xf] }
 0x469   :  { %1960 = vmatpush.bf16.msrb.mxu3 %v3566_v44  ;;  %v3113_v44 = vld [vmem:[#allocation14 + $0x8] sm:$0xf] }
 0x46a   :  { %v1052_v52 = vpop.f32.mrf.mxu2  ;;  %v1065_v53 = vpop.f32.mrf.mxu3  ;;  %1934 = vmatpush.bf16.msrb.mxu1 %v3562_v0  ;;  %v3150_v0 = vor.u32 %v3980_v36, %v3147_v37  ;;  %v3114_v46 = vor.u32 %v3976_v45, %v3113_v44  ;;  %v4017_v36 = vld [vmem:[#allocation14 + $0x16c] sm:$0xf0]  ;;  %v4077_v44 = vld [vmem:[#allocation14 + $0x354] sm:$0xf] }
 0x46b   :  { %v1066_v58 = vadd.f32 %v1065_v53, %v1052_v52  ;;  %v1028_v59 = vpop.f32.mrf.mxu0  ;;  %v1041_v60 = vpop.f32.mrf.mxu1  ;;  %v4076_v52 = vld [vmem:[#allocation14 + $0x34c] sm:$0xf]  ;;  %v3539_v45 = vld [vmem:[#allocation14 + $0x370] sm:$0xf0]  ;;  %v3282_v40 = vor.u32 %v4017_v36, %v3281_v35 }
 0x46c   :  { %v3531_v53 = vld [vmem:[#allocation14 + $0x368] sm:$0xf0]  ;;  %v4072_v59 = vld [vmem:[#allocation14 + $0x324] sm:$0xf0] }
 0x46d   :  { %v4599_v8 = vadd.f32 %v4213_v7, %v1066_v58  ;;  %v3534_v54 = vor.u32 %v4076_v52, %v3531_v53  ;;  %v3242_v58 = vor.u32 %v4008_v55, %v3241_v16  ;;  %v4004_v60 = vld [vmem:[#allocation14 + $0x10c] sm:$0xf]  ;;  %v3498_v62 = vor.u32 %v4072_v59, %v3497_v56  ;;  %v3465_v7 = vld [vmem:[#allocation14 + $0x2c8] sm:$0xf] }
 0x46e   :  { %1935 = vmatpush.bf16.msrb.mxu1 %v3530_v50  ;;  %v3246_v63 = vor.u32 %v4004_v60, %v3243_v61  ;;  %v3466_v13 = vor.u32 %v4064_v10, %v3465_v7  ;;  %v3118_v50 = vor.u32 %v3972_v48, %v3115_v49  ;;  %v3371_v52 = vld [vmem:[#allocation14 + $0x228] sm:$0xf0]  ;;  %v1071_v61 = vld [vmem:[%s4731_s10] sm:$0x3]  ;;  %v3345_v7 = vld [vmem:[#allocation14 + $0x1d0] sm:$0xf] }
 0x46f   :  { %v1073_v18 = vmul.f32 %v4599_v8, %v4599_v8  ;;  %1961 = vmatpush.bf16.msrb.mxu3 %v3534_v54  ;;  %1923 = vmatpush.bf16.msrb.mxu0 %v3242_v58  ;;  %v3374_v53 = vor.u32 %v4036_v51, %v3371_v52  ;;  %v1092_v2 = vperm.slane %v1071_v61, 0  ;;  %v1093_v3 = vperm.slane %v1071_v61, 1  ;;  %v3601_v10 = vld [vmem:[#allocation14 + $0x3d0] sm:$0xf]  ;;  %v4005_v52 = vld [vmem:[#allocation14 + $0x114] sm:$0xf] }
 0x470   :  { %1949 = vmatpush.bf16.msrb.mxu2 %v3246_v63  ;;  %v4009_v48 = vld [vmem:[#allocation14 + $0x12c] sm:$0xf0] }
 0x471   :  { %v1074_v25 = vadd.f32 %v1073_v18, %v1072_v17  ;;  %v3467_v17 = vld [vmem:[#allocation14 + $0x2e8] sm:$0xf0]  ;;  %v4073_v51 = vld [vmem:[#allocation14 + $0x32c] sm:$0xf0] }
 0x472   :  { %v1054_v28 = vpop.f32.mrf.mxu2  ;;  %v1067_v29 = vpop.f32.mrf.mxu3  ;;  %1936 = vmatpush.bf16.msrb.mxu1 %v3498_v62  ;;  %v3470_v18 = vor.u32 %v4060_v15, %v3467_v17  ;;  %v3347_v15 = vld [vmem:[#allocation14 + $0x1f0] sm:$0xf0] }
 0x473   :  { %1075 = vadd.xlane.f32.xlu2 %v1074_v25  ;;  %1962 = vmatpush.bf16.msrb.mxu3 %v3502_v4  ;;  %v3179_v25 = vld [vmem:[#allocation14 + $0xa8] sm:$0xf0]  ;;  %v4093_v17 = vld [vmem:[#allocation14 + $0x3d4] sm:$0xf] }
 0x474   :  { %1924 = vmatpush.bf16.msrb.mxu0 %v3210_v9  ;;  %1950 = vmatpush.bf16.msrb.mxu2 %v3214_v14  ;;  %v3182_v27 = vor.u32 %v3988_v24, %v3179_v25  ;;  %v4052_v28 = vld [vmem:[#allocation14 + $0x28c] sm:$0xf]  ;;  %v4033_v9 = vld [vmem:[#allocation14 + $0x1ec] sm:$0xf0]  ;;  %v3350_v25 = vor.u32 %v4029_v12, %v3347_v15  ;;  %v3989_v15 = vld [vmem:[#allocation14 + $0x94] sm:$0xf] }
 0x475   :  { %v3435_v29 = vld [vmem:[#allocation14 + $0x2a8] sm:$0xf0]  ;;  %v3346_v21 = vor.u32 %v4033_v9, %v3345_v7  ;;  %v4025_v24 = vld [vmem:[#allocation14 + $0x1ac] sm:$0xf0] }
 0x476   :  { %1937 = vmatpush.bf16.msrb.mxu1 %v3466_v13  ;;  %v3438_v30 = vor.u32 %v4052_v28, %v3435_v29  ;;  %v4089_v28 = vld [vmem:[#allocation14 + $0x3ac] sm:$0xf0]  ;;  %v4021_v29 = vld [vmem:[#allocation14 + $0x194] sm:$0xf]  ;;  %v3314_v33 = vor.u32 %v4025_v24, %v3313_v23 }
 0x477   :  { %1963 = vmatpush.bf16.msrb.mxu3 %v3470_v18  ;;  %v3603_v18 = vld [vmem:[#allocation14 + $0x3f0] sm:$0xf0]  ;;  %v3185_v9 = vld [vmem:[#allocation14 + $0x90] sm:$0xf] }
 0x478   :  { %1925 = vmatpush.bf16.msrb.mxu0 %v3178_v22  ;;  %1951 = vmatpush.bf16.msrb.mxu2 %v3182_v27  ;;  %v3602_v22 = vor.u32 %v4097_v11, %v3601_v10  ;;  %v3569_v27 = vld [vmem:[#allocation14 + $0x390] sm:$0xf] }
 0x479   :  { %v3993_v10 = vld [vmem:[#allocation14 + $0xac] sm:$0xf0] }
 0x47a   :  { %1938 = vmatpush.bf16.msrb.mxu1 %v3434_v26  ;;  %v3606_v26 = vor.u32 %v4093_v17, %v3603_v18  ;;  %v3187_v17 = vld [vmem:[#allocation14 + $0xb0] sm:$0xf0]  ;;  %v3153_v24 = vld [vmem:[#allocation14 + $0x50] sm:$0xf] }
 0x47b   :  { %1964 = vmatpush.bf16.msrb.mxu3 %v3438_v30  ;;  %v3315_v30 = vld [vmem:[#allocation14 + $0x1b0] sm:$0xf0] }
 0x47c   :  { %1926 = vmatpush.bf16.msrb.mxu0 %v3146_v34  ;;  %1952 = vmatpush.bf16.msrb.mxu2 %v3150_v0  ;;  %v3570_v34 = vor.u32 %v4089_v28, %v3569_v27  ;;  %v3318_v37 = vor.u32 %v4021_v29, %v3315_v30  ;;  %v3537_v0 = vld [vmem:[#allocation14 + $0x350] sm:$0xf]  ;;  %v4053_v18 = vld [vmem:[#allocation14 + $0x294] sm:$0xf] }
 0x47d   :  { %v3409_v28 = vld [vmem:[#allocation14 + $0x250] sm:$0xf]  ;;  %v3981_v30 = vld [vmem:[#allocation14 + $0x54] sm:$0xf] }
 0x47e   :  { %1939 = vmatpush.bf16.msrb.mxu1 %v3402_v38  ;;  %v3574_v38 = vor.u32 %v4085_v31, %v3571_v32  ;;  %v4049_v29 = vld [vmem:[#allocation14 + $0x26c] sm:$0xf0]  ;;  %v3155_v31 = vld [vmem:[#allocation14 + $0x70] sm:$0xf0] }
 0x47f   :  { %1965 = vmatpush.bf16.msrb.mxu3 %v3406_v43  ;;  %v3283_v43 = vld [vmem:[#allocation14 + $0x170] sm:$0xf0]  ;;  %v3410_v36 = vor.u32 %v4049_v29, %v3409_v28  ;;  %v3513_v29 = vld [vmem:[#allocation14 + $0x318] sm:$0xf] }
 0x480   :  { %1927 = vmatpush.bf16.msrb.mxu0 %v3114_v46  ;;  %1953 = vmatpush.bf16.msrb.mxu2 %v3118_v50  ;;  %v3538_v46 = vor.u32 %v4081_v41, %v3537_v0  ;;  %v3286_v49 = vor.u32 %v4013_v42, %v3283_v43  ;;  %v3505_v50 = vld [vmem:[#allocation14 + $0x310] sm:$0xf]  ;;  %v4045_v32 = vld [vmem:[#allocation14 + $0x254] sm:$0xf]  ;;  %v3158_v41 = vor.u32 %v3981_v30, %v3155_v31  ;;  %v4074_v30 = vld [vmem:[#allocation14 + $0x334] sm:$0xf0] }
 0x481   :  { %v4041_v0 = vld [vmem:[#allocation14 + $0x22c] sm:$0xf0]  ;;  %v3973_v43 = vld [vmem:[#allocation14 + $0x14] sm:$0xf]  ;;  %v4006_v31 = vld [vmem:[#allocation14 + $0x11c] sm:$0xf] }
 0x482   :  { %1940 = vmatpush.bf16.msrb.mxu1 %v3370_v1  ;;  %v3542_v1 = vor.u32 %v4077_v44, %v3539_v45  ;;  %v3123_v44 = vld [vmem:[#allocation14 + $0x30] sm:$0xf0] }
 0x483   :  { %1966 = vmatpush.bf16.msrb.mxu3 %v3374_v53  ;;  %v3251_v53 = vld [vmem:[#allocation14 + $0x130] sm:$0xf0] }
 0x484   :  { %v4037_v45 = vld [vmem:[#allocation14 + $0x214] sm:$0xf] }
 0x4e6   :  { %v1076_v54 = vpop.xlane.xlu2 %1075 }
 0x4e7   :  { %v1077_v16 = vmul.f32 %v1076_v54, %v4572_v39  ;;  %v4069_v54 = vld [vmem:[#allocation14 + $0x314] sm:$0xf] }
 0x4e9   :  { %v1078_v55 = vadd.f32 1e-06, %v1077_v16  ;;  %v3507_v16 = vld [vmem:[#allocation14 + $0x330] sm:$0xf0] }
 0x4ea   :  { %v3510_v61 = vor.u32 %v4069_v54, %v3507_v16  ;;  %v3611_v54 = vld [vmem:[#allocation14 + $0x3f8] sm:$0xf0]  ;;  %v3126_v16 = vor.u32 %v3973_v43, %v3123_v44  ;;  %v4066_v43 = vld [vmem:[#allocation14 + $0x2f4] sm:$0xf0] }
 0x4eb   :  { %4192 = vrsqrt.f32 %v1078_v55  ;;  %vm1085_vm7 = vweird.f32 %v1078_v55  ;;  %v3998_v44 = vld [vmem:[#allocation14 + $0xdc] sm:$0xf] }
 0x4f1   :  { %v4193_v56 = vpop.eup %4192 }
 0x4f2   :  { %v1080_v58 = vmul.f32 %v4193_v56, %v1078_v55  ;;  %vm1086_vm6 = vweird.f32 %v4193_v56  ;;  %v3250_v55 = vor.u32 %v4009_v48, %v3249_v47  ;;  %v4034_v47 = vld [vmem:[#allocation14 + $0x1f4] sm:$0xf0] }
 0x4f3   :  { %vm1087_vm8 = vmor %vm1085_vm7, %vm1086_vm6  ;;  %v3609_v48 = vld [vmem:[#allocation14 + $0x3d8] sm:$0xf] }
 0x4f4   :  { %v1081_v59 = vmul.f32 %v4193_v56, %v1080_v58  ;;  %v3217_v58 = vld [vmem:[#allocation14 + $0xd0] sm:$0xf] }
 0x4f6   :  { %v1082_v60 = vmul.f32 0.5, %v1081_v59  ;;  %v4001_v59 = vld [vmem:[#allocation14 + $0xec] sm:$0xf0] }
 0x4f8   :  { %v1083_v62 = vsub.f32 1.5, %v1082_v60  ;;  %v3254_v60 = vor.u32 %v4005_v52, %v3251_v53  ;;  %v3355_v52 = vld [vmem:[#allocation14 + $0x1f8] sm:$0xf0] }
 0x4f9   :  { %v4094_v53 = vld [vmem:[#allocation14 + $0x3dc] sm:$0xf] }
 0x4fa   :  { %v1084_v63 = vmul.f32 %v4193_v56, %v1083_v62  ;;  %v3473_v62 = vld [vmem:[#allocation14 + $0x2d0] sm:$0xf] }
 0x4fc   :  { %v1088_v4 = vsel %vm1087_vm8, %v4193_v56, %v1084_v63  ;;  %v3506_v56 = vor.u32 %v4073_v51, %v3505_v50  ;;  %v4065_v63 = vld [vmem:[#allocation14 + $0x2ec] sm:$0xf0] }
 0x4fd   :  { %v1089_v5 = vmul.f32 %v1088_v4, %v4597_v57  ;;  %v1090_v6 = vmul.f32 %v1088_v4, %v4599_v8  ;;  %v4061_v4 = vld [vmem:[#allocation14 + $0x2d4] sm:$0xf]  ;;  %v3474_v7 = vor.u32 %v4065_v63, %v3473_v62  ;;  %v3614_v62 = vor.u32 %v4094_v53, %v3611_v54  ;;  %v3577_v63 = vld [vmem:[#allocation14 + $0x398] sm:$0xf]  ;;  %v3990_v54 = vld [vmem:[#allocation14 + $0x9c] sm:$0xf] }
 0x4fe   :  { %v4058_v53 = vld [vmem:[#allocation14 + $0x2b4] sm:$0xf0] }
 0x4ff   :  { %v1096_v13 = vmul.f32 %v1092_v2, %v1089_v5  ;;  %v1097_v14 = vmul.f32 %v1093_v3, %v1090_v6  ;;  %v3997_v2 = vld [vmem:[#allocation14 + $0xd4] sm:$0xf]  ;;  %v3218_v6 = vor.u32 %v4001_v59, %v3217_v58  ;;  %v3321_v59 = vld [vmem:[#allocation14 + $0x198] sm:$0xf] }
 0x500   :  { %v3219_v3 = vld [vmem:[#allocation14 + $0xf0] sm:$0xf0] }
 0x501   :  { %v4611_v19 = vpack.c.bf16 %v1096_v13, %v1096_v13  ;;  %v4613_v20 = vpack.c.bf16 %v1097_v14, %v1097_v14  ;;  %v3475_v5 = vld [vmem:[#allocation14 + $0x2f0] sm:$0xf0]  ;;  %v3222_v11 = vor.u32 %v3997_v2, %v3219_v3  ;;  %v3441_v13 = vld [vmem:[#allocation14 + $0x290] sm:$0xf]  ;;  %v4090_v2 = vld [vmem:[#allocation14 + $0x3b4] sm:$0xf0] }
 0x502   :  { %v3478_v12 = vor.u32 %v4061_v4, %v3475_v5  ;;  %v4057_v14 = vld [vmem:[#allocation14 + $0x2ac] sm:$0xf0]  ;;  %v4022_v3 = vld [vmem:[#allocation14 + $0x19c] sm:$0xf] }
 0x503   :  { %1876 = vmatmul.bf16.vlgmr.msra.gmra.mxu0 %v4611_v19  ;;  %1889 = vmatmul.bf16.vlgmr.msra.gmra.mxu1 %v4613_v20  ;;  %v3442_v23 = vor.u32 %v4057_v14, %v3441_v13  ;;  %v3323_v4 = vld [vmem:[#allocation14 + $0x1b8] sm:$0xf0]  ;;  %v3545_v14 = vld [vmem:[#allocation14 + $0x358] sm:$0xf] }
 0x504   :  { %1902 = vmatmul.bf16.vlgmr.msra.gmra.mxu2 %v4611_v19  ;;  %1915 = vmatmul.bf16.vlgmr.msra.gmra.mxu3 %v4613_v20  ;;  %v4086_v5 = vld [vmem:[#allocation14 + $0x39c] sm:$0xf] }
 0x505   :  { %1972 = vmatpush.bf16.msra.mxu0 %v3346_v21  ;;  %1985 = vmatpush.bf16.msra.mxu1 %v3602_v22  ;;  %v3443_v21 = vld [vmem:[#allocation14 + $0x2b0] sm:$0xf0]  ;;  %v3186_v22 = vor.u32 %v3993_v10, %v3185_v9  ;;  %v3578_v9 = vor.u32 %v4090_v2, %v3577_v63  ;;  %v3289_v10 = vld [vmem:[#allocation14 + $0x158] sm:$0xf] }
 0x506   :  { %1998 = vmatpush.bf16.msra.mxu2 %v3350_v25  ;;  %2011 = vmatpush.bf16.msra.mxu3 %v3606_v26  ;;  %v3985_v25 = vld [vmem:[#allocation14 + $0x6c] sm:$0xf0]  ;;  %v3190_v26 = vor.u32 %v3989_v15, %v3187_v17  ;;  %v3446_v27 = vor.u32 %v4053_v18, %v3443_v21  ;;  %v4082_v15 = vld [vmem:[#allocation14 + $0x374] sm:$0xf0]  ;;  %v4014_v17 = vld [vmem:[#allocation14 + $0x15c] sm:$0xf] }
 0x507   :  { %v3154_v35 = vor.u32 %v3985_v25, %v3153_v24  ;;  %v3291_v18 = vld [vmem:[#allocation14 + $0x178] sm:$0xf0]  ;;  %v3546_v24 = vor.u32 %v4082_v15, %v3545_v14  ;;  %v3257_v25 = vld [vmem:[#allocation14 + $0x118] sm:$0xf] }
 0x508   :  { %v4078_v21 = vld [vmem:[#allocation14 + $0x35c] sm:$0xf]  ;;  %v3417_v2 = vld [vmem:[#allocation14 + $0x258] sm:$0xf] }
 0x509   :  { %1973 = vmatpush.bf16.msra.mxu0 %v3314_v33  ;;  %1986 = vmatpush.bf16.msra.mxu1 %v3570_v34  ;;  %v3411_v33 = vld [vmem:[#allocation14 + $0x270] sm:$0xf0]  ;;  %v3121_v34 = vld [vmem:[#allocation14 + $0x10] sm:$0xf]  ;;  %v3385_v15 = vld [vmem:[#allocation14 + $0x218] sm:$0xf] }
 0x50a   :  { %1999 = vmatpush.bf16.msra.mxu2 %v3318_v37  ;;  %2012 = vmatpush.bf16.msra.mxu3 %v3574_v38  ;;  %v3977_v37 = vld [vmem:[#allocation14 + $0x2c] sm:$0xf0]  ;;  %v3414_v42 = vor.u32 %v4045_v32, %v3411_v33  ;;  %v3259_v32 = vld [vmem:[#allocation14 + $0x138] sm:$0xf0] }
 0x50b   :  { %v3377_v38 = vld [vmem:[#allocation14 + $0x210] sm:$0xf]  ;;  %v3122_v50 = vor.u32 %v3977_v37, %v3121_v34  ;;  %v4070_v33 = vld [vmem:[#allocation14 + $0x31c] sm:$0xf]  ;;  %v3225_v37 = vld [vmem:[#allocation14 + $0xd8] sm:$0xf] }
 0x50c   :  { %v3378_v51 = vor.u32 %v4041_v0, %v3377_v38  ;;  %v3515_v34 = vld [vmem:[#allocation14 + $0x338] sm:$0xf0]  ;;  %v4002_v38 = vld [vmem:[#allocation14 + $0xf4] sm:$0xf0]  ;;  %v3262_v0 = vor.u32 %v4006_v31, %v3259_v32  ;;  %v3669_v31 = vld [vmem:[#allocation15 + $0x60] sm:$0xf] }
 0x50d   :  { %1974 = vmatpush.bf16.msra.mxu0 %v3282_v40  ;;  %1987 = vmatpush.bf16.msra.mxu1 %v3538_v46  ;;  %v3379_v40 = vld [vmem:[#allocation14 + $0x230] sm:$0xf0]  ;;  %v3353_v46 = vld [vmem:[#allocation14 + $0x1d8] sm:$0xf]  ;;  %v4112_v32 = vld [vmem:[#allocation15 + $0x64] sm:$0xf0] }
 0x50e   :  { %2000 = vmatpush.bf16.msra.mxu2 %v3286_v49  ;;  %2013 = vmatpush.bf16.msra.mxu3 %v3542_v1  ;;  %v4098_v49 = vld [vmem:[#allocation14 + $0x3f4] sm:$0xf0]  ;;  %v4030_v1 = vld [vmem:[#allocation14 + $0x1dc] sm:$0xf] }
 0x50f   :  { %v3610_v58 = vor.u32 %v4098_v49, %v3609_v48  ;;  %v3193_v49 = vld [vmem:[#allocation14 + $0x98] sm:$0xf] }
 0x511   :  { %1975 = vmatpush.bf16.msra.mxu0 %v3250_v55  ;;  %1988 = vmatpush.bf16.msra.mxu1 %v3506_v56  ;;  %v3382_v55 = vor.u32 %v4037_v45, %v3379_v40  ;;  %v3354_v56 = vor.u32 %v4034_v47, %v3353_v46  ;;  %v3227_v45 = vld [vmem:[#allocation14 + $0xf8] sm:$0xf0]  ;;  %v3226_v47 = vor.u32 %v4002_v38, %v3225_v37  ;;  %v3661_v37 = vld [vmem:[#allocation15 + $0x50] sm:$0xf]  ;;  %v4110_v38 = vld [vmem:[#allocation15 + $0x54] sm:$0xf0] }
 0x512   :  { %2001 = vmatpush.bf16.msra.mxu2 %v3254_v60  ;;  %2014 = vmatpush.bf16.msra.mxu3 %v3510_v61  ;;  %v4026_v60 = vld [vmem:[#allocation14 + $0x1b4] sm:$0xf0]  ;;  %v3358_v61 = vor.u32 %v4030_v1, %v3355_v52  ;;  %v4062_v40 = vld [vmem:[#allocation14 + $0x2dc] sm:$0xf] }
 0x513   :  { %1928 = vmatmul.bf16.vlgmr.msrb.gmra.mxu0 %v4611_v19  ;;  %1941 = vmatmul.bf16.vlgmr.msrb.gmra.mxu1 %v4613_v20  ;;  %v3483_v46 = vld [vmem:[#allocation14 + $0x2f8] sm:$0xf0]  ;;  %v3994_v1 = vld [vmem:[#allocation14 + $0xb4] sm:$0xf0] }
 0x514   :  { %1954 = vmatmul.bf16.vlgmr.msrb.gmra.mxu2 %v4611_v19  ;;  %1967 = vmatmul.bf16.vlgmr.msrb.gmra.mxu3 %v4613_v20  ;;  %v3449_v52 = vld [vmem:[#allocation14 + $0x298] sm:$0xf] }
 0x515   :  { %1976 = vmatpush.bf16.msra.mxu0 %v3218_v6  ;;  %1989 = vmatpush.bf16.msra.mxu1 %v3474_v7  ;;  %v3579_v6 = vld [vmem:[#allocation14 + $0x3b8] sm:$0xf0]  ;;  %v3322_v7 = vor.u32 %v4026_v60, %v3321_v59  ;;  %v3450_v59 = vor.u32 %v4058_v53, %v3449_v52  ;;  %v3161_v60 = vld [vmem:[#allocation14 + $0x58] sm:$0xf]  ;;  %v3637_v52 = vld [vmem:[#allocation15 + $0x20] sm:$0xf] }
 0x516   :  { %2002 = vmatpush.bf16.msra.mxu2 %v3222_v11  ;;  %2015 = vmatpush.bf16.msra.mxu3 %v3478_v12  ;;  %v4018_v11 = vld [vmem:[#allocation14 + $0x174] sm:$0xf0]  ;;  %v3326_v12 = vor.u32 %v4022_v3, %v3323_v4  ;;  %v3582_v13 = vor.u32 %v4086_v5, %v3579_v6  ;;  %v3982_v4 = vld [vmem:[#allocation14 + $0x5c] sm:$0xf]  ;;  %v4104_v53 = vld [vmem:[#allocation15 + $0x24] sm:$0xf0] }
 0x517   :  { %v4050_v3 = vld [vmem:[#allocation14 + $0x274] sm:$0xf0]  ;;  %v3163_v5 = vld [vmem:[#allocation14 + $0x78] sm:$0xf0] }
 0x518   :  { %v4046_v6 = vld [vmem:[#allocation14 + $0x25c] sm:$0xf] }
 0x519   :  { %1977 = vmatpush.bf16.msra.mxu0 %v3186_v22  ;;  %1990 = vmatpush.bf16.msra.mxu1 %v3442_v23  ;;  %v3547_v22 = vld [vmem:[#allocation14 + $0x378] sm:$0xf0]  ;;  %v3290_v23 = vor.u32 %v4018_v11, %v3289_v10  ;;  %v3418_v10 = vor.u32 %v4050_v3, %v3417_v2  ;;  %v3129_v11 = vld [vmem:[#allocation14 + $0x18] sm:$0xf]  ;;  %v3621_v2 = vld [vmem:[#allocation15] sm:$0xf] }
 0x51a   :  { %2003 = vmatpush.bf16.msra.mxu2 %v3190_v26  ;;  %2016 = vmatpush.bf16.msra.mxu3 %v3446_v27  ;;  %v4010_v26 = vld [vmem:[#allocation14 + $0x134] sm:$0xf0]  ;;  %v3294_v27 = vor.u32 %v4014_v17, %v3291_v18  ;;  %v3550_v28 = vor.u32 %v4078_v21, %v3547_v22  ;;  %v3974_v18 = vld [vmem:[#allocation14 + $0x1c] sm:$0xf]  ;;  %v4100_v3 = vld [vmem:[#allocation15 + $0x4] sm:$0xf0] }
 0x51b   :  { %v4042_v17 = vld [vmem:[#allocation14 + $0x234] sm:$0xf0]  ;;  %v3131_v21 = vld [vmem:[#allocation14 + $0x38] sm:$0xf0] }
 0x51c   :  { %v4038_v22 = vld [vmem:[#allocation14 + $0x21c] sm:$0xf] }
 0x51d   :  { %1978 = vmatpush.bf16.msra.mxu0 %v3154_v35  ;;  %1991 = vmatpush.bf16.msra.mxu1 %v3410_v36  ;;  %v3258_v35 = vor.u32 %v4010_v26, %v3257_v25  ;;  %v3514_v36 = vor.u32 %v4074_v30, %v3513_v29  ;;  %v4114_v25 = vld [vmem:[#allocation15 + $0x74] sm:$0xf0] }
 0x51e   :  { %2004 = vmatpush.bf16.msra.mxu2 %v3158_v41  ;;  %2017 = vmatpush.bf16.msra.mxu3 %v3414_v42  ;;  %v3518_v41 = vor.u32 %v4070_v33, %v3515_v34  ;;  %v3481_v42 = vld [vmem:[#allocation14 + $0x2d8] sm:$0xf]  ;;  %v3670_v33 = vor.u32 %v4112_v32, %v3669_v31  ;;  %v3741_v34 = vld [vmem:[#allocation15 + $0xf0] sm:$0xf] }
 0x51f   :  { %v3482_v48 = vor.u32 %v4066_v43, %v3481_v42  ;;  %v4128_v42 = vld [vmem:[#allocation15 + $0xe4] sm:$0xf0] }
 0x521   :  { %1979 = vmatpush.bf16.msra.mxu0 %v3122_v50  ;;  %1992 = vmatpush.bf16.msra.mxu1 %v3378_v51  ;;  %v3230_v50 = vor.u32 %v3998_v44, %v3227_v45  ;;  %v3486_v51 = vor.u32 %v4062_v40, %v3483_v46  ;;  %v3653_v44 = vld [vmem:[#allocation15 + $0x40] sm:$0xf]  ;;  %v4108_v45 = vld [vmem:[#allocation15 + $0x44] sm:$0xf0]  ;;  %v3725_v46 = vld [vmem:[#allocation15 + $0xd0] sm:$0xf] }
 0x522   :  { %2005 = vmatpush.bf16.msra.mxu2 %v3126_v16  ;;  %2018 = vmatpush.bf16.msra.mxu3 %v3382_v55  ;;  %v3195_v16 = vld [vmem:[#allocation14 + $0xb8] sm:$0xf0]  ;;  %v3654_v40 = vor.u32 %v4108_v45, %v3653_v44  ;;  %v4160_v44 = vld [vmem:[#allocation15 + $0x1e4] sm:$0xf0] }
 0x523   :  { %v4054_v55 = vld [vmem:[#allocation14 + $0x29c] sm:$0xf] }
 0x524   :  { %1980 = vmatmul.bf16.vlgmr.msra.gmra.mxu0 %v4611_v19  ;;  %1993 = vmatmul.bf16.vlgmr.msra.gmra.mxu1 %v4613_v20 }
 0x525   :  { %2024 = vmatpush.bf16.msrb.mxu0 %v3354_v56  ;;  %2037 = vmatpush.bf16.msrb.mxu1 %v3610_v58  ;;  %v3451_v56 = vld [vmem:[#allocation14 + $0x2b8] sm:$0xf0]  ;;  %v3194_v58 = vor.u32 %v3994_v1, %v3193_v49  ;;  %v3717_v1 = vld [vmem:[#allocation15 + $0xc0] sm:$0xf] }
 0x526   :  { %2050 = vmatpush.bf16.msrb.mxu2 %v3358_v61  ;;  %2063 = vmatpush.bf16.msrb.mxu3 %v3614_v62  ;;  %v3986_v61 = vld [vmem:[#allocation14 + $0x74] sm:$0xf0]  ;;  %v3198_v62 = vor.u32 %v3990_v54, %v3195_v16  ;;  %v3454_v63 = vor.u32 %v4054_v55, %v3451_v56  ;;  %v3638_v54 = vor.u32 %v4104_v53, %v3637_v52  ;;  %v3709_v16 = vld [vmem:[#allocation15 + $0xb0] sm:$0xf] }
 0x527   :  { %2006 = vmatmul.bf16.vlgmr.msra.gmra.mxu2 %v4611_v19  ;;  %2019 = vmatmul.bf16.vlgmr.msra.gmra.mxu3 %v4613_v20  ;;  %v4122_v55 = vld [vmem:[#allocation15 + $0xb4] sm:$0xf0]  ;;  %v3853_v52 = vld [vmem:[#allocation15 + $0x1d0] sm:$0xf] }
 0x528   :  { %v3710_v56 = vor.u32 %v4122_v55, %v3709_v16  ;;  %v4158_v53 = vld [vmem:[#allocation15 + $0x1d4] sm:$0xf0] }
 0x529   :  { %2025 = vmatpush.bf16.msrb.mxu0 %v3322_v7  ;;  %2038 = vmatpush.bf16.msrb.mxu1 %v3578_v9  ;;  %v3419_v7 = vld [vmem:[#allocation14 + $0x278] sm:$0xf0]  ;;  %v3162_v9 = vor.u32 %v3986_v61, %v3161_v60  ;;  %v3701_v61 = vld [vmem:[#allocation15 + $0xa0] sm:$0xf]  ;;  %v3854_v55 = vor.u32 %v4158_v53, %v3853_v52  ;;  %v4099_v53 = vld [vmem:[#allocation15 + $0x4] sm:$0xf] }
 0x52a   :  { %2051 = vmatpush.bf16.msrb.mxu2 %v3326_v12  ;;  %2064 = vmatpush.bf16.msrb.mxu3 %v3582_v13  ;;  %v3978_v12 = vld [vmem:[#allocation14 + $0x34] sm:$0xf0]  ;;  %v3166_v13 = vor.u32 %v3982_v4, %v3163_v5  ;;  %v3422_v14 = vor.u32 %v4046_v6, %v3419_v7  ;;  %v3805_v4 = vld [vmem:[#allocation15 + $0x170] sm:$0xf]  ;;  %v3622_v5 = vor.u32 %v4100_v3, %v3621_v2  ;;  %v4113_v7 = vld [vmem:[#allocation15 + $0x74] sm:$0xf] }
 0x52b   :  { %v3130_v26 = vor.u32 %v3978_v12, %v3129_v11  ;;  %v4146_v6 = vld [vmem:[#allocation15 + $0x174] sm:$0xf0]  ;;  %v3693_v12 = vld [vmem:[#allocation15 + $0x90] sm:$0xf] }
 0x52c   :  { %v4138_v2 = vld [vmem:[#allocation15 + $0x134] sm:$0xf0] }
 0x52d   :  { %2026 = vmatpush.bf16.msrb.mxu0 %v3290_v23  ;;  %2039 = vmatpush.bf16.msrb.mxu1 %v3546_v24  ;;  %v3387_v23 = vld [vmem:[#allocation14 + $0x238] sm:$0xf0]  ;;  %v3677_v24 = vld [vmem:[#allocation15 + $0x70] sm:$0xf] }
 0x52e   :  { %2052 = vmatpush.bf16.msrb.mxu2 %v3294_v27  ;;  %2065 = vmatpush.bf16.msrb.mxu3 %v3550_v28  ;;  %v3386_v27 = vor.u32 %v4042_v17, %v3385_v15  ;;  %v3134_v28 = vor.u32 %v3974_v18, %v3131_v21  ;;  %v3390_v29 = vor.u32 %v4038_v22, %v3387_v23  ;;  %v3797_v15 = vld [vmem:[#allocation15 + $0x160] sm:$0xf]  ;;  %v4144_v17 = vld [vmem:[#allocation15 + $0x164] sm:$0xf0]  ;;  %v4111_v21 = vld [vmem:[#allocation15 + $0x64] sm:$0xf] }
 0x52f   :  { %v3678_v30 = vor.u32 %v4114_v25, %v3677_v24  ;;  %v3798_v18 = vor.u32 %v4144_v17, %v3797_v15  ;;  %v3671_v22 = vld [vmem:[#allocation15 + $0x68] sm:$0xf0]  ;;  %v3685_v24 = vld [vmem:[#allocation15 + $0x80] sm:$0xf]  ;;  %v4116_v25 = vld [vmem:[#allocation15 + $0x84] sm:$0xf0] }
 0x530   :  { %v3674_v23 = vor.u32 %v4111_v21, %v3671_v22  ;;  %v4136_v21 = vld [vmem:[#allocation15 + $0x124] sm:$0xf0] }
 0x531   :  { %2027 = vmatpush.bf16.msrb.mxu0 %v3258_v35  ;;  %2040 = vmatpush.bf16.msrb.mxu1 %v3514_v36  ;;  %v4130_v35 = vld [vmem:[#allocation15 + $0xf4] sm:$0xf0] }
 0x532   :  { %2053 = vmatpush.bf16.msrb.mxu2 %v3262_v0  ;;  %2066 = vmatpush.bf16.msrb.mxu3 %v3518_v41  ;;  %v3742_v36 = vor.u32 %v4130_v35, %v3741_v34  ;;  %v3662_v0 = vor.u32 %v4110_v38, %v3661_v37  ;;  %v3733_v41 = vld [vmem:[#allocation15 + $0xe0] sm:$0xf]  ;;  %v3789_v35 = vld [vmem:[#allocation15 + $0x150] sm:$0xf] }
 0x533   :  { %v3734_v43 = vor.u32 %v4128_v42, %v3733_v41  ;;  %v3663_v41 = vld [vmem:[#allocation15 + $0x58] sm:$0xf0] }
 0x535   :  { %2028 = vmatpush.bf16.msrb.mxu0 %v3226_v47  ;;  %2041 = vmatpush.bf16.msrb.mxu1 %v3482_v48  ;;  %v3645_v47 = vld [vmem:[#allocation15 + $0x30] sm:$0xf]  ;;  %v4106_v48 = vld [vmem:[#allocation15 + $0x34] sm:$0xf0] }
 0x536   :  { %2054 = vmatpush.bf16.msrb.mxu2 %v3230_v50  ;;  %2067 = vmatpush.bf16.msrb.mxu3 %v3486_v51  ;;  %v3646_v49 = vor.u32 %v4106_v48, %v3645_v47  ;;  %v4124_v50 = vld [vmem:[#allocation15 + $0xc4] sm:$0xf0]  ;;  %v3781_v47 = vld [vmem:[#allocation15 + $0x140] sm:$0xf] }
 0x537   :  { %v3718_v51 = vor.u32 %v4124_v50, %v3717_v1  ;;  %v4140_v48 = vld [vmem:[#allocation15 + $0x144] sm:$0xf0]  ;;  %v4107_v1 = vld [vmem:[#allocation15 + $0x44] sm:$0xf]  ;;  %v3655_v50 = vld [vmem:[#allocation15 + $0x48] sm:$0xf0] }
 0x539   :  { %2029 = vmatpush.bf16.msrb.mxu0 %v3194_v58  ;;  %2042 = vmatpush.bf16.msrb.mxu1 %v3450_v59  ;;  %v3629_v58 = vld [vmem:[#allocation15 + $0x10] sm:$0xf]  ;;  %v4102_v59 = vld [vmem:[#allocation15 + $0x14] sm:$0xf0] }
 0x53a   :  { %2055 = vmatpush.bf16.msrb.mxu2 %v3198_v62  ;;  %2068 = vmatpush.bf16.msrb.mxu3 %v3454_v63  ;;  %v3630_v60 = vor.u32 %v4102_v59, %v3629_v58  ;;  %v4120_v62 = vld [vmem:[#allocation15 + $0xa4] sm:$0xf0]  ;;  %v3727_v58 = vld [vmem:[#allocation15 + $0xd8] sm:$0xf0] }
 0x53b   :  { %v3702_v63 = vor.u32 %v4120_v62, %v3701_v61 }
 0x53d   :  { %2030 = vmatpush.bf16.msrb.mxu0 %v3162_v9  ;;  %2043 = vmatpush.bf16.msrb.mxu1 %v3418_v10  ;;  %v3679_v9 = vld [vmem:[#allocation15 + $0x78] sm:$0xf0]  ;;  %v3806_v10 = vor.u32 %v4146_v6, %v3805_v4  ;;  %v4105_v4 = vld [vmem:[#allocation15 + $0x34] sm:$0xf] }
 0x53e   :  { %2056 = vmatpush.bf16.msrb.mxu2 %v3166_v13  ;;  %2069 = vmatpush.bf16.msrb.mxu3 %v3422_v14  ;;  %v3682_v11 = vor.u32 %v4113_v7, %v3679_v9  ;;  %v4118_v13 = vld [vmem:[#allocation15 + $0x94] sm:$0xf0]  ;;  %v3845_v9 = vld [vmem:[#allocation15 + $0x1c0] sm:$0xf] }
 0x53f   :  { %v3694_v14 = vor.u32 %v4118_v13, %v3693_v12  ;;  %v4123_v13 = vld [vmem:[#allocation15 + $0xc4] sm:$0xf] }
 0x541   :  { %2031 = vmatpush.bf16.msrb.mxu0 %v3130_v26  ;;  %2044 = vmatpush.bf16.msrb.mxu1 %v3386_v27  ;;  %v3869_v26 = vld [vmem:[#allocation15 + $0x1f0] sm:$0xf]  ;;  %v3686_v27 = vor.u32 %v4116_v25, %v3685_v24  ;;  %v3639_v24 = vld [vmem:[#allocation15 + $0x28] sm:$0xf0] }
 0x542   :  { %2057 = vmatpush.bf16.msrb.mxu2 %v3134_v28  ;;  %2070 = vmatpush.bf16.msrb.mxu3 %v3390_v29  ;;  %v4162_v28 = vld [vmem:[#allocation15 + $0x1f4] sm:$0xf0]  ;;  %v4129_v29 = vld [vmem:[#allocation15 + $0xf4] sm:$0xf]  ;;  %v3837_v25 = vld [vmem:[#allocation15 + $0x1b0] sm:$0xf] }
 0x544   :  { %2032 = vmatmul.bf16.vlgmr.msrb.gmra.mxu0 %v4611_v19  ;;  %2045 = vmatmul.bf16.vlgmr.msrb.gmra.mxu1 %v4613_v20 }
 0x545   :  { %2548 = vmatpush.bf16.msra.mxu0 %v3678_v30  ;;  %2058 = vmatmul.bf16.vlgmr.msrb.gmra.mxu2 %v4611_v19  ;;  %v4126_v19 = vld [vmem:[#allocation15 + $0xd4] sm:$0xf0]  ;;  %v3743_v30 = vld [vmem:[#allocation15 + $0xf8] sm:$0xf0] }
 0x546   :  { %2071 = vmatmul.bf16.vlgmr.msrb.gmra.mxu3 %v4613_v20  ;;  %2561 = vmatpush.bf16.msra.mxu1 %v3742_v36  ;;  %v3726_v20 = vor.u32 %v4126_v19, %v3725_v46  ;;  %v3746_v34 = vor.u32 %v4129_v29, %v3743_v30  ;;  %v4142_v36 = vld [vmem:[#allocation15 + $0x154] sm:$0xf0]  ;;  %v4127_v46 = vld [vmem:[#allocation15 + $0xe4] sm:$0xf]  ;;  %v3735_v19 = vld [vmem:[#allocation15 + $0xe8] sm:$0xf0] }
 0x547   :  { %2574 = vmatpush.bf16.msra.mxu2 %v3806_v10  ;;  %v3790_v38 = vor.u32 %v4142_v36, %v3789_v35  ;;  %v4156_v10 = vld [vmem:[#allocation15 + $0x1c4] sm:$0xf0]  ;;  %v4154_v29 = vld [vmem:[#allocation15 + $0x1b4] sm:$0xf0]  ;;  %v4121_v30 = vld [vmem:[#allocation15 + $0xb4] sm:$0xf] }
 0x548   :  { %v3846_v12 = vor.u32 %v4156_v10, %v3845_v9  ;;  %v3757_v36 = vld [vmem:[#allocation15 + $0x110] sm:$0xf]  ;;  %v4117_v10 = vld [vmem:[#allocation15 + $0x94] sm:$0xf] }
 0x549   :  { %2549 = vmatpush.bf16.msra.mxu0 %v3670_v33  ;;  %v3870_v33 = vor.u32 %v4162_v28, %v3869_v26 }
 0x54a   :  { %2562 = vmatpush.bf16.msra.mxu1 %v3734_v43  ;;  %v3861_v43 = vld [vmem:[#allocation15 + $0x1e0] sm:$0xf] }
 0x54b   :  { %2575 = vmatpush.bf16.msra.mxu2 %v3798_v18  ;;  %2587 = vmatpush.bf16.msra.mxu3 %v3870_v33  ;;  %v3765_v18 = vld [vmem:[#allocation15 + $0x120] sm:$0xf] }
 0x54c   :  { %v3766_v22 = vor.u32 %v4136_v21, %v3765_v18  ;;  %v3799_v18 = vld [vmem:[#allocation15 + $0x168] sm:$0xf0] }
 0x54d   :  { %2550 = vmatpush.bf16.msra.mxu0 %v3662_v0  ;;  %v4109_v0 = vld [vmem:[#allocation15 + $0x54] sm:$0xf] }
 0x54e   :  { %2563 = vmatpush.bf16.msra.mxu1 %v3726_v20  ;;  %v3666_v42 = vor.u32 %v4109_v0, %v3663_v41  ;;  %v3738_v20 = vor.u32 %v4127_v46, %v3735_v19  ;;  %v4152_v46 = vld [vmem:[#allocation15 + $0x1a4] sm:$0xf0] }
 0x54f   :  { %2576 = vmatpush.bf16.msra.mxu2 %v3790_v38  ;;  %v4134_v38 = vld [vmem:[#allocation15 + $0x114] sm:$0xf0] }
 0x550   :  { %v3758_v41 = vor.u32 %v4134_v38, %v3757_v36 }
 0x551   :  { %2551 = vmatpush.bf16.msra.mxu0 %v3654_v40  ;;  %v3862_v40 = vor.u32 %v4160_v44, %v3861_v43  ;;  %v3631_v43 = vld [vmem:[#allocation15 + $0x18] sm:$0xf0] }
 0x552   :  { %2564 = vmatpush.bf16.msra.mxu1 %v3718_v51  ;;  %v3658_v51 = vor.u32 %v4107_v1, %v3655_v50  ;;  %v3703_v1 = vld [vmem:[#allocation15 + $0xa8] sm:$0xf0]  ;;  %v3749_v50 = vld [vmem:[#allocation15 + $0x100] sm:$0xf] }
 0x553   :  { %2588 = vmatpush.bf16.msra.mxu3 %v3862_v40  ;;  %v3829_v40 = vld [vmem:[#allocation15 + $0x1a0] sm:$0xf] }
 0x555   :  { %2552 = vmatpush.bf16.msra.mxu0 %v3646_v49  ;;  %v3782_v49 = vor.u32 %v4140_v48, %v3781_v47  ;;  %v3830_v47 = vor.u32 %v4152_v46, %v3829_v40  ;;  %v4119_v48 = vld [vmem:[#allocation15 + $0xa4] sm:$0xf] }
 0x556   :  { %2565 = vmatpush.bf16.msra.mxu1 %v3710_v56  ;;  %v4125_v56 = vld [vmem:[#allocation15 + $0xd4] sm:$0xf] }
 0x557   :  { %2577 = vmatpush.bf16.msra.mxu2 %v3782_v49  ;;  %v3730_v62 = vor.u32 %v4125_v56, %v3727_v58  ;;  %2589 = vmatpush.bf16.msra.mxu3 %v3854_v55  ;;  %v3706_v55 = vor.u32 %v4119_v48, %v3703_v1  ;;  %v3807_v56 = vld [vmem:[#allocation15 + $0x178] sm:$0xf0] }
 0x559   :  { %2553 = vmatpush.bf16.msra.mxu0 %v3638_v54 }
 0x55a   :  { %2566 = vmatpush.bf16.msra.mxu1 %v3702_v63  ;;  %v3773_v63 = vld [vmem:[#allocation15 + $0x130] sm:$0xf] }
 0x55b   :  { %v3774_v3 = vor.u32 %v4138_v2, %v3773_v63  ;;  %2590 = vmatpush.bf16.msra.mxu3 %v3846_v12 }
 0x55d   :  { %2554 = vmatpush.bf16.msra.mxu0 %v3630_v60  ;;  %2578 = vmatpush.bf16.msra.mxu2 %v3774_v3  ;;  %v3821_v3 = vld [vmem:[#allocation15 + $0x190] sm:$0xf] }
 0x55e   :  { %2567 = vmatpush.bf16.msra.mxu1 %v3694_v14  ;;  %v3719_v14 = vld [vmem:[#allocation15 + $0xc8] sm:$0xf0] }
 0x55f   :  { %v3722_v17 = vor.u32 %v4123_v13, %v3719_v14 }
 0x561   :  { %2555 = vmatpush.bf16.msra.mxu0 %v3622_v5  ;;  %v3647_v5 = vld [vmem:[#allocation15 + $0x38] sm:$0xf0]  ;;  %2579 = vmatpush.bf16.msra.mxu2 %v3766_v22 }
 0x562   :  { %2568 = vmatpush.bf16.msra.mxu1 %v3686_v27  ;;  %v3650_v7 = vor.u32 %v4105_v4, %v3647_v5  ;;  %v4150_v4 = vld [vmem:[#allocation15 + $0x194] sm:$0xf0] }
 0x563   :  { %v3822_v9 = vor.u32 %v4150_v4, %v3821_v3 }
 0x565   :  { %2600 = vmatpush.bf16.msrb.mxu0 %v3682_v11  ;;  %2580 = vmatpush.bf16.msra.mxu2 %v3758_v41  ;;  %v4141_v41 = vld [vmem:[#allocation15 + $0x154] sm:$0xf] }
 0x566   :  { %2613 = vmatpush.bf16.msrb.mxu1 %v3746_v34  ;;  %v3838_v34 = vor.u32 %v4154_v29, %v3837_v25  ;;  %v3687_v29 = vld [vmem:[#allocation15 + $0x88] sm:$0xf0] }
 0x568   :  { %2591 = vmatpush.bf16.msra.mxu3 %v3838_v34 }
 0x569   :  { %2601 = vmatpush.bf16.msrb.mxu0 %v3674_v23  ;;  %v4103_v23 = vld [vmem:[#allocation15 + $0x24] sm:$0xf] }
 0x56a   :  { %2614 = vmatpush.bf16.msrb.mxu1 %v3738_v20  ;;  %v3642_v28 = vor.u32 %v4103_v23, %v3639_v24  ;;  %v3813_v23 = vld [vmem:[#allocation15 + $0x180] sm:$0xf]  ;;  %v4148_v24 = vld [vmem:[#allocation15 + $0x184] sm:$0xf0] }
 0x56c   :  { %2592 = vmatpush.bf16.msra.mxu3 %v3830_v47  ;;  %v3863_v47 = vld [vmem:[#allocation15 + $0x1e8] sm:$0xf0] }
 0x56d   :  { %2602 = vmatpush.bf16.msrb.mxu0 %v3666_v42  ;;  %v4101_v42 = vld [vmem:[#allocation15 + $0x14] sm:$0xf] }
 0x56e   :  { %2615 = vmatpush.bf16.msrb.mxu1 %v3730_v62 }
 0x570   :  { %2593 = vmatpush.bf16.msra.mxu3 %v3822_v9  ;;  %v4137_v9 = vld [vmem:[#allocation15 + $0x134] sm:$0xf] }
 0x571   :  { %2603 = vmatpush.bf16.msrb.mxu0 %v3658_v51  ;;  %v4132_v51 = vld [vmem:[#allocation15 + $0x104] sm:$0xf0] }
 0x572   :  { %2616 = vmatpush.bf16.msrb.mxu1 %v3722_v17  ;;  %v3750_v62 = vor.u32 %v4132_v51, %v3749_v50  ;;  %v4143_v17 = vld [vmem:[#allocation15 + $0x164] sm:$0xf] }
 0x573   :  { %v3802_v22 = vor.u32 %v4143_v17, %v3799_v18  ;;  %v4155_v17 = vld [vmem:[#allocation15 + $0x1c4] sm:$0xf]  ;;  %v3847_v18 = vld [vmem:[#allocation15 + $0x1c8] sm:$0xf0] }
 0x574   :  { %2581 = vmatpush.bf16.msra.mxu2 %v3750_v62 }
 0x575   :  { %2604 = vmatpush.bf16.msrb.mxu0 %v3650_v7 }
 0x579   :  { %2605 = vmatpush.bf16.msrb.mxu0 %v3642_v28  ;;  %v4115_v28 = vld [vmem:[#allocation15 + $0x84] sm:$0xf] }
 0x57a   :  { %v3690_v34 = vor.u32 %v4115_v28, %v3687_v29 }
 0x580   :  { %v1877_v31 = vpop.f32.mrf.mxu0  ;;  %v1890_v32 = vpop.f32.mrf.mxu1 }
 0x581   :  { %v4631_v37 = vadd.f32 %v1890_v32, %v1877_v31  ;;  %v3711_v31 = vld [vmem:[#allocation15 + $0xb8] sm:$0xf0] }
 0x582   :  { %v3714_v35 = vor.u32 %v4121_v30, %v3711_v31  ;;  %v4161_v30 = vld [vmem:[#allocation15 + $0x1f4] sm:$0xf] }
 0x583   :  { %v3615_v45 = vmul.f32 -1.442695, %v4631_v37 }
 0x584   :  { %2617 = vmatpush.bf16.msrb.mxu1 %v3714_v35  ;;  %v3871_v35 = vld [vmem:[#allocation15 + $0x1f8] sm:$0xf0] }
 0x585   :  { %4194 = vpow2.f32 %v3615_v45  ;;  %v3634_v45 = vor.u32 %v4101_v42, %v3631_v43  ;;  %v3874_v38 = vor.u32 %v4161_v30, %v3871_v35  ;;  %v3791_v42 = vld [vmem:[#allocation15 + $0x158] sm:$0xf0] }
 0x587   :  { %v1903_v54 = vpop.f32.mrf.mxu2  ;;  %v1916_v16 = vpop.f32.mrf.mxu3  ;;  %2606 = vmatpush.bf16.msrb.mxu0 %v3634_v45  ;;  %v3794_v45 = vor.u32 %v4141_v41, %v3791_v42  ;;  %v3759_v41 = vld [vmem:[#allocation15 + $0x118] sm:$0xf0] }
 0x588   :  { %v4634_v59 = vadd.f32 %v1916_v16, %v1903_v54  ;;  %v1879_v60 = vpop.f32.mrf.mxu0  ;;  %v1892_v61 = vpop.f32.mrf.mxu1  ;;  %v3623_v54 = vld [vmem:[#allocation15 + $0x8] sm:$0xf0]  ;;  %v4145_v16 = vld [vmem:[#allocation15 + $0x174] sm:$0xf]  ;;  %2618 = vmatpush.bf16.msrb.mxu1 %v3706_v55 }
 0x589   :  { %v3626_v63 = vor.u32 %v4099_v53, %v3623_v54  ;;  %v3810_v2 = vor.u32 %v4145_v16, %v3807_v56 }
 0x58a   :  { %v3616_v6 = vmul.f32 -1.442695, %v4634_v59 }
 0x58b   :  { %v4195_v11 = vpop.eup %4194  ;;  %2607 = vmatpush.bf16.msrb.mxu0 %v3626_v63  ;;  %2626 = vmatpush.bf16.msrb.mxu2 %v3810_v2  ;;  %v4157_v63 = vld [vmem:[#allocation15 + $0x1d4] sm:$0xf]  ;;  %v3855_v2 = vld [vmem:[#allocation15 + $0x1d8] sm:$0xf0] }
 0x58c   :  { %v4637_v15 = vadd.f32 1.0, %v4195_v11  ;;  %4196 = vpow2.f32 %v3616_v6  ;;  %v3695_v11 = vld [vmem:[#allocation15 + $0x98] sm:$0xf0] }
 0x58d   :  { %v3698_v14 = vor.u32 %v4117_v10, %v3695_v11  ;;  %v3775_v10 = vld [vmem:[#allocation15 + $0x138] sm:$0xf0] }
 0x58e   :  { %4198 = vrcp.f32 %v4637_v15  ;;  %v2101_v13 = vand.u32 2147483647, %v4637_v15  ;;  %vm2097_vm10 = vweird.f32 %v4637_v15 }
 0x58f   :  { %v1905_v26 = vpop.f32.mrf.mxu2  ;;  %v1918_v27 = vpop.f32.mrf.mxu3  ;;  %2619 = vmatpush.bf16.msrb.mxu1 %v3698_v14  ;;  %2627 = vmatpush.bf16.msrb.mxu2 %v3802_v22  ;;  %v3778_v14 = vor.u32 %v4137_v9, %v3775_v10 }
 0x590   :  { %v1929_v32 = vpop.f32.mrf.mxu0  ;;  %v1942_v33 = vpop.f32.mrf.mxu1  ;;  %v3814_v27 = vor.u32 %v4148_v24, %v3813_v23  ;;  %vm2102_vm13 = vcmp.eq.f32.partialorder %v2101_v13, 8.507059e+37 }
 0x591   :  { %v4640_v0 = vadd.f32 %v1942_v33, %v1929_v32  ;;  %v2103_v32 = vand.u32 2147483648, %v4637_v15 }
 0x592   :  { %v4197_v44 = vpop.eup %4196  ;;  %2594 = vmatpush.bf16.msra.mxu3 %v3814_v27 }
 0x593   :  { %v4642_v19 = vadd.f32 1.0, %v4197_v44  ;;  %v3617_v20 = vmul.f32 -1.442695, %v4640_v0  ;;  %v2104_v48 = vor.u32 1.1754944e-38, %v2103_v32  ;;  %2620 = vmatpush.bf16.msrb.mxu1 %v3690_v34  ;;  %2628 = vmatpush.bf16.msrb.mxu2 %v3794_v45  ;;  %v4153_v32 = vld [vmem:[#allocation15 + $0x1b4] sm:$0xf] }
 0x594   :  { %v4645_v49 = vpop.eup %4198  ;;  %v4151_v45 = vld [vmem:[#allocation15 + $0x1a4] sm:$0xf] }
 0x595   :  { %v2093_v52 = vmul.f32 %v4645_v49, %v4637_v15  ;;  %4200 = vrcp.f32 %v4642_v19  ;;  %vm2098_vm9 = vweird.f32 %v4645_v49  ;;  %vm2112_vm14 = vweird.f32 %v4642_v19 }
 0x596   :  { %4202 = vpow2.f32 %v3617_v20  ;;  %vm4667_vm11 = vmor %vm2097_vm10, %vm2098_vm9  ;;  %2639 = vmatpush.bf16.msrb.mxu3 %v3874_v38  ;;  %v4159_v20 = vld [vmem:[#allocation15 + $0x1e4] sm:$0xf]  ;;  %v2118_v51 = vand.u32 2147483648, %v4642_v19  ;;  %v2116_v55 = vand.u32 2147483647, %v4642_v19  ;;  %vm2657_vm9 = vcmask 1047559  }
 0x597   :  { %v2094_v58 = vsub.f32 1.0, %v2093_v52  ;;  %v1955_v60 = vpop.f32.mrf.mxu2  ;;  %v1968_v61 = vpop.f32.mrf.mxu3  ;;  %v3866_v50 = vor.u32 %v4159_v20, %v3863_v47  ;;  %v3783_v52 = vld [vmem:[#allocation15 + $0x148] sm:$0xf0]  ;;  %v4133_v38 = vld [vmem:[#allocation15 + $0x114] sm:$0xf] }
 0x598   :  { %v4650_v5 = vadd.f32 %v1968_v61, %v1955_v60  ;;  %v1931_v6 = vpop.f32.mrf.mxu0  ;;  %v1944_v7 = vpop.f32.mrf.mxu1  ;;  %vm2117_vm0 = vcmp.eq.f32.partialorder %v2116_v55, 8.507059e+37  ;;  %v3751_v20 = vld [vmem:[#allocation15 + $0x108] sm:$0xf0]  ;;  %v4149_v47 = vld [vmem:[#allocation15 + $0x194] sm:$0xf] }
 0x599   :  { %v2095_v12 = vmul.f32 %v4645_v49, %v2094_v58  ;;  %v2119_v7 = vor.u32 1.1754944e-38, %v2118_v51  ;;  %v4147_v55 = vld [vmem:[#allocation15 + $0x184] sm:$0xf] }
 0x59a   :  { %v3618_v21 = vmul.f32 -1.442695, %v4650_v5  ;;  %2640 = vmatpush.bf16.msrb.mxu3 %v3866_v50 }
 0x59b   :  { %v4655_v25 = vpop.eup %4200  ;;  %v2096_v26 = vadd.f32 %v4645_v49, %v2095_v12 }
 0x59c   :  { %v4203_v31 = vpop.eup %4202  ;;  %v2108_v33 = vmul.f32 %v4655_v25, %v4642_v19  ;;  %4204 = vpow2.f32 %v3618_v21  ;;  %vm2113_vm12 = vweird.f32 %v4655_v25  ;;  %v3858_v19 = vor.u32 %v4157_v63, %v3855_v2 }
 0x59d   :  { %v4663_v36 = vadd.f32 1.0, %v4203_v31  ;;  %v2100_v40 = vsel %vm4667_vm11, %v4645_v49, %v2096_v26  ;;  %v4139_v49 = vld [vmem:[#allocation15 + $0x144] sm:$0xf]  ;;  %vm4683_vm15 = vmor %vm2112_vm14, %vm2113_vm12  ;;  %v3850_v21 = vor.u32 %v4155_v17, %v3847_v18 }
 0x59e   :  { %v2109_v44 = vsub.f32 1.0, %v2108_v33  ;;  %v2105_v54 = vsel %vm2102_vm13, %v2104_v48, %v2100_v40  ;;  %v3786_v60 = vor.u32 %v4139_v49, %v3783_v52  ;;  %2641 = vmatpush.bf16.msrb.mxu3 %v3858_v19  ;;  %v3839_v33 = vld [vmem:[#allocation15 + $0x1b8] sm:$0xf0]  ;;  %v3831_v40 = vld [vmem:[#allocation15 + $0x1a8] sm:$0xf0] }
 0x59f   :  { %v1957_v15 = vpop.f32.mrf.mxu2  ;;  %v1970_v46 = vpop.f32.mrf.mxu3  ;;  %4206 = vrcp.f32 %v4663_v36  ;;  %v2152_v6 = vmul.f32 %v2105_v54, %v4631_v37  ;;  %v4135_v37 = vld [vmem:[#allocation15 + $0x124] sm:$0xf]  ;;  %v3842_v35 = vor.u32 %v4153_v32, %v3839_v33  ;;  %v3823_v48 = vld [vmem:[#allocation15 + $0x198] sm:$0xf0]  ;;  %vm2127_vm2 = vweird.f32 %v4663_v36 }
 0x5a0   :  { %v2110_v1 = vmul.f32 %v4655_v25, %v2109_v44  ;;  %2629 = vmatpush.bf16.msrb.mxu2 %v3786_v60  ;;  %v3834_v15 = vor.u32 %v4151_v45, %v3831_v40  ;;  %v4131_v46 = vld [vmem:[#allocation15 + $0x104] sm:$0xf]  ;;  %v2131_v61 = vand.u32 2147483647, %v4663_v36 }
 0x5a1   :  { %v1981_v56 = vpop.f32.mrf.mxu0  ;;  %v1994_v58 = vpop.f32.mrf.mxu1  ;;  %v3754_v52 = vor.u32 %v4131_v46, %v3751_v20 }
 0x5a2   :  { %v4205_v53 = vpop.eup %4204  ;;  %v2111_v16 = vadd.f32 %v4655_v25, %v2110_v1  ;;  %v1995_v62 = vadd.f32 %v1994_v58, %v1981_v56  ;;  %2642 = vmatpush.bf16.msrb.mxu3 %v3850_v21  ;;  %v3815_v56 = vld [vmem:[#allocation15 + $0x188] sm:$0xf0]  ;;  %v2133_v58 = vand.u32 2147483648, %v4663_v36  ;;  %vm2132_vm4 = vcmp.eq.f32.partialorder %v2131_v61, 8.507059e+37 }
 0x5a3   :  { %v4690_v4 = vadd.f32 1.0, %v4205_v53  ;;  %v3826_v53 = vor.u32 %v4149_v47, %v3823_v48  ;;  %v3818_v60 = vor.u32 %v4147_v55, %v3815_v56 }
 0x5a4   :  { %v2115_v3 = vsel %vm4683_vm15, %v4655_v25, %v2111_v16  ;;  %v2156_v13 = vmul.f32 %v2152_v6, %v1995_v62  ;;  %v3767_v25 = vld [vmem:[#allocation15 + $0x128] sm:$0xf0]  ;;  %2630 = vmatpush.bf16.msrb.mxu2 %v3778_v14  ;;  %v2134_v2 = vor.u32 1.1754944e-38, %v2133_v58 }
 0x5a5   :  { %v4693_v11 = vpop.eup %4206  ;;  %v2120_v12 = vsel %vm2117_vm0, %v2119_v7, %v2115_v3  ;;  %4208 = vrcp.f32 %v4690_v4  ;;  %v3770_v31 = vor.u32 %v4135_v37, %v3767_v25  ;;  %v2148_v6 = vand.u32 2147483648, %v4690_v4 }
 0x5a6   :  { %v2160_v22 = vpack.c.bf16 %v2156_v13, %v2156_v13  ;;  %v2153_v26 = vmul.f32 %v2120_v12, %v4634_v59  ;;  %v2123_v27 = vmul.f32 %v4693_v11, %v4663_v36  ;;  %v3762_v59 = vor.u32 %v4133_v38, %v3759_v41  ;;  %2643 = vmatpush.bf16.msrb.mxu3 %v3842_v35 }
 0x5a7   :  { %vm2128_vm1 = vweird.f32 %v4693_v11  ;;  %vm2142_vm6 = vweird.f32 %v4690_v4  ;;  %v2146_v7 = vand.u32 2147483647, %v4690_v4  ;;  %v2149_v13 = vor.u32 1.1754944e-38, %v2148_v6 }
 0x5a8   :  { %2556 = vmatmul.bf16.vlgmr.msra.gmra.mxu0 %v2160_v22  ;;  %v2124_v43 = vsub.f32 1.0, %v2123_v27  ;;  %2631 = vmatpush.bf16.msrb.mxu2 %v3770_v31  ;;  %vm2129_vm3 = vmor %vm2127_vm2, %vm2128_vm1 }
 0x5a9   :  { %v1983_v29 = vpop.f32.mrf.mxu0  ;;  %v1996_v30 = vpop.f32.mrf.mxu1  ;;  %vm2147_vm8 = vcmp.eq.f32.partialorder %v2146_v7, 8.507059e+37 }
 0x5aa   :  { %v2007_v23 = vpop.f32.mrf.mxu2  ;;  %v2020_v24 = vpop.f32.mrf.mxu3  ;;  %v2125_v49 = vmul.f32 %v4693_v11, %v2124_v43  ;;  %2644 = vmatpush.bf16.msrb.mxu3 %v3834_v15 }
 0x5ab   :  { %v2021_v28 = vadd.f32 %v2020_v24, %v2007_v23  ;;  %v4209_v42 = vpop.eup %4208 }
 0x5ac   :  { %v2138_v1 = vmul.f32 %v4209_v42, %v4690_v4  ;;  %2632 = vmatpush.bf16.msrb.mxu2 %v3762_v59  ;;  %v2126_v16 = vadd.f32 %v4693_v11, %v2125_v49  ;;  %vm2143_vm5 = vweird.f32 %v4209_v42 }
 0x5ad   :  { %v2157_v34 = vmul.f32 %v2153_v26, %v2021_v28  ;;  %vm2144_vm7 = vmor %vm2142_vm6, %vm2143_vm5 }
 0x5ae   :  { %v2139_v54 = vsub.f32 1.0, %v2138_v1  ;;  %2645 = vmatpush.bf16.msrb.mxu3 %v3826_v53  ;;  %v2130_v63 = vsel %vm2129_vm3, %v4693_v11, %v2126_v16 }
 0x5af   :  { %v2161_v44 = vpack.c.bf16 %v2157_v34, %v2157_v34  ;;  %v2135_v3 = vsel %vm2132_vm4, %v2134_v2, %v2130_v63 }
 0x5b0   :  { %2633 = vmatpush.bf16.msrb.mxu2 %v3754_v52  ;;  %v2140_v62 = vmul.f32 %v4209_v42, %v2139_v54  ;;  %v2154_v36 = vmul.f32 %v2135_v3, %v4640_v0 }
 0x5b1   :  { %2569 = vmatmul.bf16.vlgmr.msra.gmra.mxu1 %v2161_v44 }
 0x5b2   :  { %v2009_v50 = vpop.f32.mrf.mxu2  ;;  %v2022_v51 = vpop.f32.mrf.mxu3  ;;  %2646 = vmatpush.bf16.msrb.mxu3 %v3818_v60  ;;  %v2141_v19 = vadd.f32 %v4209_v42, %v2140_v62 }
 0x5b4   :  { %v2145_v11 = vsel %vm2144_vm7, %v4209_v42, %v2141_v19 }
 0x5b5   :  { %v2150_v17 = vsel %vm2147_vm8, %v2149_v13, %v2145_v11 }
 0x5b6   :  { %v2155_v23 = vmul.f32 %v2150_v17, %v4650_v5 }
 0x5b8   :  { %2608 = vmatmul.bf16.vlgmr.msrb.gmra.mxu0 %v2160_v22 }
 0x5c1   :  { %v2033_v9 = vpop.f32.mrf.mxu0  ;;  %v2046_v10 = vpop.f32.mrf.mxu1  ;;  %2621 = vmatmul.bf16.vlgmr.msrb.gmra.mxu1 %v2161_v44 }
 0x5c2   :  { %v2047_v12 = vadd.f32 %v2046_v10, %v2033_v9  ;;  %v2691_v10 = vlaneseq }
 0x5c4   :  { %v2158_v14 = vmul.f32 %v2154_v36, %v2047_v12  ;;  %vm2693_vm13 = vcmp.lt.s32.totalorder %v2691_v10, 256 }
 0x5c6   :  { %v2162_v18 = vpack.c.bf16 %v2158_v14, %v2158_v14 }
 0x5c8   :  { %v2059_v21 = vpop.f32.mrf.mxu2  ;;  %2582 = vmatmul.bf16.vlgmr.msra.gmra.mxu2 %v2162_v18 }
 0x5c9   :  { %v2072_v22 = vpop.f32.mrf.mxu3  ;;  %v2035_v4 = vpop.f32.mrf.mxu0 }
 0x5ca   :  { %v2073_v24 = vadd.f32 %v2072_v22, %v2059_v21  ;;  %v2048_v37 = vpop.f32.mrf.mxu1 }
 0x5cc   :  { %v2159_v25 = vmul.f32 %v2155_v23, %v2073_v24 }
 0x5ce   :  { %v2163_v26 = vpack.c.bf16 %v2159_v25, %v2159_v25 }
 0x5d0   :  { %2595 = vmatmul.bf16.vlgmr.msra.gmra.mxu3 %v2163_v26  ;;  %v2061_v0 = vpop.f32.mrf.mxu2 }
 0x5d1   :  { %v2074_v27 = vpop.f32.mrf.mxu3 }
 0x5d8   :  { %2634 = vmatmul.bf16.vlgmr.msrb.gmra.mxu2 %v2162_v18 }
 0x5e0   :  { %2647 = vmatmul.bf16.vlgmr.msrb.gmra.mxu3 %v2163_v26 }
 0x625   :  { %v2557_v28 = vpop.f32.mrf.mxu0 }
 0x62d   :  { %v2559_v30 = vpop.f32.mrf.mxu0 }
 0x62e   :  { %v2570_v29 = vpop.f32.mrf.mxu1 }
 0x62f   :  { %v2571_v42 = vadd.f32 %v2570_v29, %v2557_v28 }
 0x635   :  { %v2609_v32 = vpop.f32.mrf.mxu0 }
 0x636   :  { %v2572_v31 = vpop.f32.mrf.mxu1 }
 0x63d   :  { %v2611_v34 = vpop.f32.mrf.mxu0 }
 0x63e   :  { %v2622_v33 = vpop.f32.mrf.mxu1 }
 0x63f   :  { %v2623_v40 = vadd.f32 %v2622_v33, %v2609_v32 }
 0x646   :  { %v2624_v35 = vpop.f32.mrf.mxu1 }
 0x64b   :  { %v2583_v38 = vpop.f32.mrf.mxu2 }
 0x64c   :  { %v2584_v44 = vadd.f32 %v2583_v38, %v2571_v42 }
 0x653   :  { %v2596_v5 = vpop.f32.mrf.mxu3  ;;  %v2585_v41 = vpop.f32.mrf.mxu2 }
 0x654   :  { %v2597_v45 = vadd.f32 %v2596_v5, %v2584_v44 }
 0x656   :  { %v2652_v15 = vadd.f32 %v2597_v45, %v4597_v57 }
 0x658   :  { %v2655_v50 = vmul.f32 %v2652_v15, %v2652_v15 }
 0x65a   :  { %v2658_v49 = vsel %vm2657_vm9, %v2655_v50, 0.0 }
 0x65b   :  { %v2598_v43 = vpop.f32.mrf.mxu3  ;;  %v2635_v59 = vpop.f32.mrf.mxu2 }
 0x65c   :  { %v2636_v46 = vadd.f32 %v2635_v59, %v2623_v40 }
 0x663   :  { %v2648_v20 = vpop.f32.mrf.mxu3  ;;  %v2637_v48 = vpop.f32.mrf.mxu2 }
 0x664   :  { %v2649_v47 = vadd.f32 %v2648_v20, %v2636_v46 }
 0x666   :  { %v2653_v1 = vadd.f32 %v2649_v47, %v4599_v8  ;;  %v2654_v8 = vld [vmem:[%s4732_s11] sm:$0x3]  ;;  %s2703_s11 = sshll.u32 %s4733_s12, 4  ;;  %s2704_s11 = int_to_ptr.hbm [resolvable:$true] %s2703_s11 }
 0x667   :  { %v2678_v2 = vperm.slane %v2654_v8, 0  ;;  %v2679_v3 = vperm.slane %v2654_v8, 1 }
 0x668   :  { %v2656_v51 = vmul.f32 %v2653_v1, %v2653_v1 }
 0x66a   :  { %v2659_v52 = vsel %vm2657_vm9, %v2656_v51, 0.0 }
 0x66b   :  { %v2650_v53 = vpop.f32.mrf.mxu3  ;;  %v2660_v54 = vadd.f32 %v2659_v52, %v2658_v49 }
 0x66d   :  { %2661 = vadd.xlane.f32.xlu0 %v2660_v54 }
 0x6e0   :  { %v2662_v16 = vpop.xlane.xlu0 %2661 }
 0x6e1   :  { %v2663_v55 = vmul.f32 %v2662_v16, %v4572_v39 }
 0x6e3   :  { %v2664_v56 = vadd.f32 1e-06, %v2663_v55 }
 0x6e5   :  { %4210 = vrsqrt.f32 %v2664_v56  ;;  %vm2671_vm11 = vweird.f32 %v2664_v56 }
 0x6eb   :  { %v4211_v57 = vpop.eup %4210 }
 0x6ec   :  { %v2666_v58 = vmul.f32 %v4211_v57, %v2664_v56  ;;  %vm2672_vm10 = vweird.f32 %v4211_v57 }
 0x6ed   :  { %vm2673_vm12 = vmor %vm2671_vm11, %vm2672_vm10 }
 0x6ee   :  { %v2667_v60 = vmul.f32 %v4211_v57, %v2666_v58 }
 0x6f0   :  { %v2668_v61 = vmul.f32 0.5, %v2667_v60 }
 0x6f2   :  { %v2669_v62 = vsub.f32 1.5, %v2668_v61 }
 0x6f4   :  { %v2670_v63 = vmul.f32 %v4211_v57, %v2669_v62 }
 0x6f6   :  { %v2674_v19 = vsel %vm2673_vm12, %v4211_v57, %v2670_v63 }
 0x6f7   :  { %v2675_v6 = vmul.f32 %v2674_v19, %v2652_v15  ;;  %v2676_v39 = vmul.f32 %v2674_v19, %v2653_v1 }
 0x6f9   :  { %v2682_v7 = vmul.f32 %v2678_v2, %v2675_v6  ;;  %v2683_v9 = vmul.f32 %v2679_v3, %v2676_v39 }
 0x6fb   :  { %2686 = vst [vmem:[#allocation1] sm:$0xff] %v2682_v7 }
 0x6fc   :  { %2687 = vst [vmem:[#allocation1 + $0x9] sm:$0xff] %v2683_v9 }
 0x703   :  { %v2689_v36 = vld [vmem:[#allocation1 + $0x7] ss:$9 sm:$0xff] }
 0x704   :  { %2695 = vst.msk [vmem:[#allocation17] sm:$0x3] %vm2693_vm13, %v2689_v36 }
 0x705   :  { %2706 = dma.vmem_to_hbm [thread:$0]  %s2702_s0, 32, %s2704_s11, [#allocation5]  }
 0x706   :  { %4440 = dma.done.wait [#allocation5], 32  }
 0x707   :  { %4441 = vsyncadd [#allocation5], 4294967264 }
 0x708   :  { %2711 = vsyncpa [#allocation4], 1 }
 0x709   :  { %2712 = vsyncpa [#allocation7], 1 }
 0x70a   :  { %2713 = vsyncpa [#allocation10], 1 }
 0x70b   :  { %2714 = vsyncpa [#allocation13], 1 }
 0x70c   :  { %2715 = vsyncpa [#allocation16], 1 }
 0x70d   :  { %2716 = vsyncpa [#allocation5], 1 }

</bundles_post_ra>
